<compile_context>
chip_gen: v7x
topology: tpu7x:2x2x1
jax: 0.10.0
libtpu: 0.0.40
codegen_flags: <defaults>
</compile_context>

<pallas_src>
import functools

import jax
import jax.numpy as jnp
import numpy as np
from jax import lax
from jax.experimental import pallas as pl
from jax.experimental.pallas import tpu as pltpu


# ----------------------------------------------------------------------------
# Fused kernel: [conv3x3 + bias + LeakyReLU + InstanceNorm + AdaIN] x 2
# ----------------------------------------------------------------------------
def _decoder_block_kernel(x_ref, w1_ref, b1_ref, s1s_ref, s1b_ref,
                          w2_ref, b2_ref, s2s_ref, s2b_ref, out_ref,
                          *, H, W, eps, neg_slope, mm_dtype):
    # x_ref   : (1, Ci1p, S)   one batch element, spatial flat on lanes (f32)
    # w*_ref  : (Cop, 9*Cip)   im2col weight matrix (mm_dtype), tap-major
    # b*_ref  : (Cop, 1)       conv bias column (f32)
    # s*s/s*b : (1, Cop, 1)    pre-split AdaIN style scale / bias (f32)
    # out_ref : (1, Cop, S)
    S = H * W
    inv_S = 1.0 / S

    # Boundary masks for the 9 taps, built ONCE, shared by both conv stages.
    # Tap k = (dy+1)*3 + (dx+1) matches the OIHW cross-correlation ordering.
    flat = jax.lax.broadcasted_iota(jnp.int32, (1, S), 1)
    col = flat % W
    row_m = {-1: flat >= W, 0: None, 1: flat < (H - 1) * W}
    col_m = {-1: col >= 1, 0: None, 1: col <= W - 2}
    shifts, masks = [], []
    for dy in (-1, 0, 1):
        for dx in (-1, 0, 1):
            rm, cm = row_m[dy], col_m[dx]
            m = (cm if rm is None else rm if cm is None
                 else jnp.logical_and(rm, cm))
            shifts.append(dy * W + dx)
            masks.append(m)

    def im2col(x):
        # x: (Ci, S) f32 -> (9*Ci, S) mm_dtype patch slab (single MXU operand).
        slabs = []
        for k in range(9):
            d = shifts[k]
            xs = x if d == 0 else pltpu.roll(x, shift=(-d) % S, axis=1)
            if masks[k] is not None:
                xs = jnp.where(masks[k], xs, 0.0)
            slabs.append(xs)
        return jnp.concatenate(slabs, axis=0).astype(mm_dtype)

    def conv_in_adain(x, w_ref, b_ref, ss_ref, sb_ref):
        # conv3x3 (one im2col matmul) + bias + LeakyReLU + InstanceNorm+AdaIN.
        patches = im2col(x)                                   # (9*Ci, S)
        y = jnp.dot(w_ref[...], patches,
                    preferred_element_type=jnp.float32)       # (Co, S) f32
        y = y + b_ref[...]
        y = jnp.where(y > 0, y, neg_slope * y)                # LeakyReLU(0.2)
        # One-pass stats; mean folded into the AdaIN bias so the centered
        # temporary is never materialized.
        s1 = jnp.sum(y, axis=1, keepdims=True)                # (Co, 1)
        s2 = jnp.sum(y * y, axis=1, keepdims=True)            # (Co, 1)
        mean = s1 * inv_S
        var = jnp.maximum(s2 * inv_S - mean * mean, 0.0)
        inv_std = jax.lax.rsqrt(var + eps)                    # EUP rsqrt
        scale = ss_ref[0] * inv_std                           # (Co, 1)
        bias = sb_ref[0] - scale * mean                       # (Co, 1)
        return scale * y + bias                               # (Co, S) f32

    x = x_ref[0]                                              # (Ci1p, S) f32
    a1 = conv_in_adain(x, w1_ref, b1_ref, s1s_ref, s1b_ref)
    a2 = conv_in_adain(a1, w2_ref, b2_ref, s2s_ref, s2b_ref)
    out_ref[0] = a2.astype(out_ref.dtype)


# ----------------------------------------------------------------------------
# Bilinear x2 upsample (align_corners=False), NCHW, PyTorch-style.
# Gather-free: fixed 0.25/0.75 lerps with edge-clamped shifts.  (XLA glue.)
# ----------------------------------------------------------------------------
def upsample_bilinear_x2_nchw(x):
    def up1d(v, axis):
        n = v.shape[axis]
        lo = jnp.concatenate([lax.slice_in_dim(v, 0, 1, axis=axis),
                              lax.slice_in_dim(v, 0, n - 1, axis=axis)],
                             axis=axis)                       # v[i-1], clamped
        hi = jnp.concatenate([lax.slice_in_dim(v, 1, n, axis=axis),
                              lax.slice_in_dim(v, n - 1, n, axis=axis)],
                             axis=axis)                       # v[i+1], clamped
        even = 0.25 * lo + 0.75 * v                           # out[2i]
        odd = 0.75 * v + 0.25 * hi                            # out[2i+1]
        st = jnp.stack([even, odd], axis=axis + 1)
        new_shape = v.shape[:axis] + (2 * n,) + v.shape[axis + 1:]
        return st.reshape(new_shape)

    x = up1d(x, 2)   # H
    x = up1d(x, 3)   # W
    return x


# ----------------------------------------------------------------------------
# Wrapper: DecoderBlock forward (NCHW in/out, like PyTorch)
# ----------------------------------------------------------------------------
def _round_up(n, m):
    return ((n + m - 1) // m) * m


def _pad_axis(a, size, axis):
    pad = size - a.shape[axis]
    if pad == 0:
        return a
    widths = [(0, 0)] * a.ndim
    widths[axis] = (0, pad)
    return jnp.pad(a, widths)


def _conv_w_mat(w_oihw, ci_pad, co_pad, dtype):
    """(Co, Ci, 3, 3) OIHW -> (Co_pad, 9*Ci_pad) im2col matrix (tap-major)."""
    co, ci, kh, kw = w_oihw.shape
    w = jnp.transpose(w_oihw, (0, 2, 3, 1))                   # (Co, 3, 3, Ci)
    w = jnp.pad(w, ((0, co_pad - co), (0, 0), (0, 0), (0, ci_pad - ci)))
    return w.reshape(co_pad, kh * kw * ci_pad).astype(dtype)


def decoder_block_forward(x_nchw, w_latent, params, upsample=False, *,
                          eps=1e-8, neg_slope=0.2,
                          matmul_dtype=jnp.bfloat16):
    if upsample:
        x_nchw = upsample_bilinear_x2_nchw(x_nchw)
    B, Cin, H, W = x_nchw.shape
    Cout = params["conv1_w"].shape[0]
    S = H * W
    assert S % 128 == 0, f"H*W={S} must be a multiple of 128 (lane width)"

    ci1p = _round_up(Cin, 8)                 # pad input channels to f32 tiles
    cop = _round_up(Cout, 8)

    # (B, Cin, H, W) -> (B, Ci1p, S): reshape is free; channel pad fuses with
    # the upsample output write under jit.
    x_flat = _pad_axis(x_nchw.reshape(B, Cin, S), ci1p, axis=1)

    w1 = _conv_w_mat(params["conv1_w"], ci1p, cop, matmul_dtype)
    w2 = _conv_w_mat(params["conv2_w"], cop, cop, matmul_dtype)
    b1 = _pad_axis(params["conv1_b"], cop, 0).reshape(cop, 1)
    b2 = _pad_axis(params["conv2_b"], cop, 0).reshape(cop, 1)

    # AdaIN style projection hoisted out of the kernel; pre-split scale/bias.
    def split_style(aff_w, aff_b):
        st = w_latent @ aff_w + aff_b                          # (B, 2*Cout)
        sc = _pad_axis(st[:, :Cout], cop, 1)[:, :, None]       # (B, Cop, 1)
        bi = _pad_axis(st[:, Cout:], cop, 1)[:, :, None]
        return sc, bi

    s1s, s1b = split_style(params["aff1_w"], params["aff1_b"])
    s2s, s2b = split_style(params["aff2_w"], params["aff2_b"])

    kernel = functools.partial(_decoder_block_kernel, H=H, W=W, eps=eps,
                               neg_slope=neg_slope, mm_dtype=matmul_dtype)

    out_flat = pl.pallas_call(
        kernel,
        out_shape=jax.ShapeDtypeStruct((B, cop, S), jnp.float32),
        grid=(B,),
        in_specs=[
            pl.BlockSpec((1, ci1p, S), lambda b: (b, 0, 0)),       # x
            pl.BlockSpec((cop, 9 * ci1p), lambda b: (0, 0)),       # w1
            pl.BlockSpec((cop, 1), lambda b: (0, 0)),              # b1
            pl.BlockSpec((1, cop, 1), lambda b: (b, 0, 0)),        # style1 scale
            pl.BlockSpec((1, cop, 1), lambda b: (b, 0, 0)),        # style1 bias
            pl.BlockSpec((cop, 9 * cop), lambda b: (0, 0)),        # w2
            pl.BlockSpec((cop, 1), lambda b: (0, 0)),              # b2
            pl.BlockSpec((1, cop, 1), lambda b: (b, 0, 0)),        # style2 scale
            pl.BlockSpec((1, cop, 1), lambda b: (b, 0, 0)),        # style2 bias
        ],
        out_specs=pl.BlockSpec((1, cop, S), lambda b: (b, 0, 0)),
        compiler_params=pltpu.CompilerParams(
            dimension_semantics=("parallel",),
            vmem_limit_bytes=64 * 1024 * 1024),
    )(x_flat, w1, b1, s1s, s1b, w2, b2, s2s, s2b)

    return out_flat[:, :Cout].reshape(B, Cout, H, W)


# ----------------------------------------------------------------------------
# Pure-JAX reference (for correctness check)
# ----------------------------------------------------------------------------
def _ref_conv_in_adain(x, cw, cb, w_lat, aw, ab, eps=1e-8):
    y = jax.lax.conv_general_dilated(
        x, cw, window_strides=(1, 1), padding=((1, 1), (1, 1)),
        dimension_numbers=("NCHW", "OIHW", "NCHW"))
    y = y + cb[None, :, None, None]
    y = jnp.where(y > 0, y, 0.2 * y)
    mean = jnp.mean(y, axis=(2, 3), keepdims=True)
    yc = y - mean
    std = jnp.sqrt(jnp.mean(yc * yc, axis=(2, 3), keepdims=True) + eps)
    y = yc / std
    style = w_lat @ aw + ab                                    # (B, 2*Cout)
    Cout = cw.shape[0]
    scale = style[:, :Cout, None, None]
    bias = style[:, Cout:, None, None]
    return scale * y + bias


def decoder_block_ref(x_nchw, w_latent, params, upsample=False):
    if upsample:
        x_nchw = upsample_bilinear_x2_nchw(x_nchw)
    x = _ref_conv_in_adain(x_nchw, params["conv1_w"], params["conv1_b"],
                           w_latent, params["aff1_w"], params["aff1_b"])
    x = _ref_conv_in_adain(x, params["conv2_w"], params["conv2_b"],
                           w_latent, params["aff2_w"], params["aff2_b"])
    return x


# ----------------------------------------------------------------------------
if __name__ == "__main__":
    B, Cin, Cout, L, H, W = 2, 4, 8, 32, 16, 16
    upsample = True

    key = jax.random.PRNGKey(0)
    keys = jax.random.split(key, 10)

    params = {
        "conv1_w": 0.1 * jax.random.normal(keys[0], (Cout, Cin, 3, 3), jnp.float32),
        "conv1_b": 0.1 * jax.random.normal(keys[1], (Cout,), jnp.float32),
        "aff1_w": 0.1 * jax.random.normal(keys[2], (L, 2 * Cout), jnp.float32),
        "aff1_b": 0.1 * jax.random.normal(keys[3], (2 * Cout,), jnp.float32),
        "conv2_w": 0.1 * jax.random.normal(keys[4], (Cout, Cout, 3, 3), jnp.float32),
        "conv2_b": 0.1 * jax.random.normal(keys[5], (Cout,), jnp.float32),
        "aff2_w": 0.1 * jax.random.normal(keys[6], (L, 2 * Cout), jnp.float32),
        "aff2_b": 0.1 * jax.random.normal(keys[7], (2 * Cout,), jnp.float32),
    }

    x = jax.random.normal(keys[8], (B, Cin, H, W), jnp.float32)       # NCHW
    w_latent = jax.random.normal(keys[9], (B, L), jnp.float32)

    ref = jax.block_until_ready(
        decoder_block_ref(x, w_latent, params, upsample=upsample))
    assert ref.shape == (B, Cout, 2 * H, 2 * W), ref.shape

    # 1) f32 MXU operands: tight check against the reference (kernel math).
    fwd_f32 = jax.jit(functools.partial(decoder_block_forward,
                                        upsample=upsample,
                                        matmul_dtype=jnp.float32))
    out_f32 = jax.block_until_ready(fwd_f32(x, w_latent, params))
    assert out_f32.shape == ref.shape, out_f32.shape
    np.testing.assert_allclose(np.asarray(out_f32), np.asarray(ref),
                               rtol=2e-4, atol=2e-4)

    # 2) bf16 MXU operands (optimized default for v6e/v7x): loose check.
    fwd_bf16 = jax.jit(functools.partial(decoder_block_forward,
                                         upsample=upsample,
                                         matmul_dtype=jnp.bfloat16))
    out_bf16 = jax.block_until_ready(fwd_bf16(x, w_latent, params))
    assert out_bf16.shape == ref.shape, out_bf16.shape
    np.testing.assert_allclose(np.asarray(out_bf16), np.asarray(ref),
                               rtol=5e-2, atol=5e-2)

    print("KERNEL_OK")
</pallas_src>

<mosaic_0001>
module attributes {stable_mosaic.version = 11 : i64} {
  func.func @_decoder_block_kernel(%arg0: i32, %arg1: memref<1x8x1024xf32, #tpu.memory_space<vmem>>, %arg2: memref<8x72xf32, #tpu.memory_space<vmem>>, %arg3: memref<8x1xf32, #tpu.memory_space<vmem>>, %arg4: memref<1x8x1xf32, #tpu.memory_space<vmem>>, %arg5: memref<1x8x1xf32, #tpu.memory_space<vmem>>, %arg6: memref<8x72xf32, #tpu.memory_space<vmem>>, %arg7: memref<8x1xf32, #tpu.memory_space<vmem>>, %arg8: memref<1x8x1xf32, #tpu.memory_space<vmem>>, %arg9: memref<1x8x1xf32, #tpu.memory_space<vmem>>, %arg10: memref<1x8x1024xf32, #tpu.memory_space<vmem>>) attributes {dimension_semantics = [#tpu.dimension_semantics<parallel>], iteration_bounds = array<i64: 2>, scalar_prefetch = 0 : i64, scratch_operands = 0 : i64, tpu.core_type = #tpu.core_type<tc>, window_params = [{transform_indices = @transform_0, window_bounds = array<i64: 1, 8, 1024>}, {pipeline_mode = #tpu.pipeline_mode<synchronous>, transform_indices = @transform_1, window_bounds = array<i64: 8, 72>}, {pipeline_mode = #tpu.pipeline_mode<synchronous>, transform_indices = @transform_2, window_bounds = array<i64: 8, 1>}, {transform_indices = @transform_3, window_bounds = array<i64: 1, 8, 1>}, {transform_indices = @transform_4, window_bounds = array<i64: 1, 8, 1>}, {pipeline_mode = #tpu.pipeline_mode<synchronous>, transform_indices = @transform_5, window_bounds = array<i64: 8, 72>}, {pipeline_mode = #tpu.pipeline_mode<synchronous>, transform_indices = @transform_6, window_bounds = array<i64: 8, 1>}, {transform_indices = @transform_7, window_bounds = array<i64: 1, 8, 1>}, {transform_indices = @transform_8, window_bounds = array<i64: 1, 8, 1>}, {transform_indices = @transform_9, window_bounds = array<i64: 1, 8, 1024>}]} {
    %0 = tpu.iota {dimensions = array<i32: 1>} : vector<1x1024xi32>
    %c32_i32 = arith.constant 32 : i32
    %c0_i32 = arith.constant 0 : i32
    %1 = arith.cmpi eq, %c32_i32, %c0_i32 : i32
    %c1_i32 = arith.constant 1 : i32
    %2 = arith.select %1, %c1_i32, %c32_i32 : i32
    %3 = vector.broadcast %2 : i32 to vector<1x1024xi32>
    %4 = arith.remsi %0, %3 : vector<1x1024xi32>
    %c0_i32_0 = arith.constant 0 : i32
    %5 = vector.broadcast %c0_i32_0 : i32 to vector<1x1024xi32>
    %6 = arith.cmpi ne, %4, %5 : vector<1x1024xi32>
    %c0_i32_1 = arith.constant 0 : i32
    %7 = vector.broadcast %c0_i32_1 : i32 to vector<1x1024xi32>
    %8 = arith.cmpi slt, %4, %7 : vector<1x1024xi32>
    %c0_i32_2 = arith.constant 0 : i32
    %9 = arith.cmpi slt, %2, %c0_i32_2 : i32
    %10 = vector.broadcast %9 : i1 to vector<1x1024xi1>
    %11 = vector.broadcast %10 : vector<1x1024xi1> to vector<1x1024xi1>
    %12 = arith.xori %8, %11 : vector<1x1024xi1>
    %13 = arith.andi %12, %6 : vector<1x1024xi1>
    %14 = vector.broadcast %2 : i32 to vector<1x1024xi32>
    %15 = arith.addi %4, %14 : vector<1x1024xi32>
    %16 = arith.select %13, %15, %4 : vector<1x1024xi1>, vector<1x1024xi32>
    %c32_i32_3 = arith.constant 32 : i32
    %17 = vector.broadcast %c32_i32_3 : i32 to vector<1x1024xi32>
    %18 = arith.cmpi sge, %0, %17 : vector<1x1024xi32>
    %c992_i32 = arith.constant 992 : i32
    %19 = vector.broadcast %c992_i32 : i32 to vector<1x1024xi32>
    %20 = arith.cmpi slt, %0, %19 : vector<1x1024xi32>
    %c1_i32_4 = arith.constant 1 : i32
    %21 = vector.broadcast %c1_i32_4 : i32 to vector<1x1024xi32>
    %22 = arith.cmpi sge, %16, %21 : vector<1x1024xi32>
    %c30_i32 = arith.constant 30 : i32
    %23 = vector.broadcast %c30_i32 : i32 to vector<1x1024xi32>
    %24 = arith.cmpi sle, %16, %23 : vector<1x1024xi32>
    %25 = arith.andi %18, %22 : vector<1x1024xi1>
    %26 = arith.andi %18, %24 : vector<1x1024xi1>
    %27 = arith.andi %20, %22 : vector<1x1024xi1>
    %28 = arith.andi %20, %24 : vector<1x1024xi1>
    %c0 = arith.constant 0 : index
    %c0_5 = arith.constant 0 : index
    %c0_6 = arith.constant 0 : index
    %29 = vector.load %arg1[%c0, %c0_5, %c0_6] : memref<1x8x1024xf32, #tpu.memory_space<vmem>>, vector<1x8x1024xf32>
    %30 = vector.shape_cast %29 : vector<1x8x1024xf32> to vector<8x1024xf32>
    %c33_i32 = arith.constant 33 : i32
    %31 = tpu.dynamic_rotate %30 by %c33_i32 dim 1 : vector<8x1024xf32>, i32 -> vector<8x1024xf32>
    %cst = arith.constant 0.000000e+00 : f32
    %32 = vector.shape_cast %25 : vector<1x1024xi1> to vector<1x1024xi1>
    %33 = vector.broadcast %32 : vector<1x1024xi1> to vector<8x1024xi1>
    %34 = vector.broadcast %cst : f32 to vector<8x1024xf32>
    %35 = arith.select %33, %31, %34 : vector<8x1024xi1>, vector<8x1024xf32>
    %c32_i32_7 = arith.constant 32 : i32
    %36 = tpu.dynamic_rotate %30 by %c32_i32_7 dim 1 : vector<8x1024xf32>, i32 -> vector<8x1024xf32>
    %cst_8 = arith.constant 0.000000e+00 : f32
    %37 = vector.shape_cast %18 : vector<1x1024xi1> to vector<1x1024xi1>
    %38 = vector.broadcast %37 : vector<1x1024xi1> to vector<8x1024xi1>
    %39 = vector.broadcast %cst_8 : f32 to vector<8x1024xf32>
    %40 = arith.select %38, %36, %39 : vector<8x1024xi1>, vector<8x1024xf32>
    %c31_i32 = arith.constant 31 : i32
    %41 = tpu.dynamic_rotate %30 by %c31_i32 dim 1 : vector<8x1024xf32>, i32 -> vector<8x1024xf32>
    %cst_9 = arith.constant 0.000000e+00 : f32
    %42 = vector.shape_cast %26 : vector<1x1024xi1> to vector<1x1024xi1>
    %43 = vector.broadcast %42 : vector<1x1024xi1> to vector<8x1024xi1>
    %44 = vector.broadcast %cst_9 : f32 to vector<8x1024xf32>
    %45 = arith.select %43, %41, %44 : vector<8x1024xi1>, vector<8x1024xf32>
    %c1_i32_10 = arith.constant 1 : i32
    %46 = tpu.dynamic_rotate %30 by %c1_i32_10 dim 1 : vector<8x1024xf32>, i32 -> vector<8x1024xf32>
    %cst_11 = arith.constant 0.000000e+00 : f32
    %47 = vector.shape_cast %22 : vector<1x1024xi1> to vector<1x1024xi1>
    %48 = vector.broadcast %47 : vector<1x1024xi1> to vector<8x1024xi1>
    %49 = vector.broadcast %cst_11 : f32 to vector<8x1024xf32>
    %50 = arith.select %48, %46, %49 : vector<8x1024xi1>, vector<8x1024xf32>
    %c1023_i32 = arith.constant 1023 : i32
    %51 = tpu.dynamic_rotate %30 by %c1023_i32 dim 1 : vector<8x1024xf32>, i32 -> vector<8x1024xf32>
    %cst_12 = arith.constant 0.000000e+00 : f32
    %52 = vector.shape_cast %24 : vector<1x1024xi1> to vector<1x1024xi1>
    %53 = vector.broadcast %52 : vector<1x1024xi1> to vector<8x1024xi1>
    %54 = vector.broadcast %cst_12 : f32 to vector<8x1024xf32>
    %55 = arith.select %53, %51, %54 : vector<8x1024xi1>, vector<8x1024xf32>
    %c993_i32 = arith.constant 993 : i32
    %56 = tpu.dynamic_rotate %30 by %c993_i32 dim 1 : vector<8x1024xf32>, i32 -> vector<8x1024xf32>
    %cst_13 = arith.constant 0.000000e+00 : f32
    %57 = vector.shape_cast %27 : vector<1x1024xi1> to vector<1x1024xi1>
    %58 = vector.broadcast %57 : vector<1x1024xi1> to vector<8x1024xi1>
    %59 = vector.broadcast %cst_13 : f32 to vector<8x1024xf32>
    %60 = arith.select %58, %56, %59 : vector<8x1024xi1>, vector<8x1024xf32>
    %c992_i32_14 = arith.constant 992 : i32
    %61 = tpu.dynamic_rotate %30 by %c992_i32_14 dim 1 : vector<8x1024xf32>, i32 -> vector<8x1024xf32>
    %cst_15 = arith.constant 0.000000e+00 : f32
    %62 = vector.shape_cast %20 : vector<1x1024xi1> to vector<1x1024xi1>
    %63 = vector.broadcast %62 : vector<1x1024xi1> to vector<8x1024xi1>
    %64 = vector.broadcast %cst_15 : f32 to vector<8x1024xf32>
    %65 = arith.select %63, %61, %64 : vector<8x1024xi1>, vector<8x1024xf32>
    %c991_i32 = arith.constant 991 : i32
    %66 = tpu.dynamic_rotate %30 by %c991_i32 dim 1 : vector<8x1024xf32>, i32 -> vector<8x1024xf32>
    %cst_16 = arith.constant 0.000000e+00 : f32
    %67 = vector.shape_cast %28 : vector<1x1024xi1> to vector<1x1024xi1>
    %68 = vector.broadcast %67 : vector<1x1024xi1> to vector<8x1024xi1>
    %69 = vector.broadcast %cst_16 : f32 to vector<8x1024xf32>
    %70 = arith.select %68, %66, %69 : vector<8x1024xi1>, vector<8x1024xf32>
    %71 = tpu.concatenate %35, %40, %45, %50, %30, %55, %60, %65, %70 in 0 : vector<8x1024xf32>, vector<8x1024xf32>, vector<8x1024xf32>, vector<8x1024xf32>, vector<8x1024xf32>, vector<8x1024xf32>, vector<8x1024xf32>, vector<8x1024xf32>, vector<8x1024xf32> -> vector<72x1024xf32>
    %c0_17 = arith.constant 0 : index
    %c0_18 = arith.constant 0 : index
    %72 = vector.load %arg2[%c0_17, %c0_18] : memref<8x72xf32, #tpu.memory_space<vmem>>, vector<8x72xf32>
    %cst_19 = arith.constant dense<0.000000e+00> : vector<8x1024xf32>
    %73 = tpu.matmul %72, %71, %cst_19 {dimension_numbers = #tpu.dot_dimension_numbers<[1], [0], [0], [1], [0, 0, 1, 1], [], []>} : vector<8x72xf32>, vector<72x1024xf32>, vector<8x1024xf32> -> vector<8x1024xf32>
    %c0_20 = arith.constant 0 : index
    %c0_21 = arith.constant 0 : index
    %74 = vector.load %arg3[%c0_20, %c0_21] : memref<8x1xf32, #tpu.memory_space<vmem>>, vector<8x1xf32>
    %75 = vector.broadcast %74 : vector<8x1xf32> to vector<8x1024xf32>
    %76 = arith.addf %73, %75 : vector<8x1024xf32>
    %cst_22 = arith.constant 0.000000e+00 : f32
    %77 = vector.broadcast %cst_22 : f32 to vector<8x1024xf32>
    %78 = arith.cmpf ogt, %76, %77 : vector<8x1024xf32>
    %cst_23 = arith.constant 2.000000e-01 : f32
    %79 = vector.broadcast %cst_23 : f32 to vector<8x1024xf32>
    %80 = arith.mulf %79, %76 : vector<8x1024xf32>
    %81 = arith.select %78, %76, %80 : vector<8x1024xi1>, vector<8x1024xf32>
    %cst_24 = arith.constant dense<0.000000e+00> : vector<8xf32>
    %82 = vector.multi_reduction <add>, %81, %cst_24 [1] : vector<8x1024xf32> to vector<8xf32>
    %83 = vector.shape_cast %82 : vector<8xf32> to vector<8x1xf32>
    %84 = arith.mulf %81, %81 : vector<8x1024xf32>
    %cst_25 = arith.constant dense<0.000000e+00> : vector<8xf32>
    %85 = vector.multi_reduction <add>, %84, %cst_25 [1] : vector<8x1024xf32> to vector<8xf32>
    %86 = vector.shape_cast %85 : vector<8xf32> to vector<8x1xf32>
    %cst_26 = arith.constant 9.765625E-4 : f32
    %87 = vector.broadcast %cst_26 : f32 to vector<8x1xf32>
    %88 = arith.mulf %83, %87 : vector<8x1xf32>
    %cst_27 = arith.constant 9.765625E-4 : f32
    %89 = vector.broadcast %cst_27 : f32 to vector<8x1xf32>
    %90 = arith.mulf %86, %89 : vector<8x1xf32>
    %91 = arith.mulf %88, %88 : vector<8x1xf32>
    %92 = arith.subf %90, %91 : vector<8x1xf32>
    %cst_28 = arith.constant 0.000000e+00 : f32
    %93 = vector.broadcast %cst_28 : f32 to vector<8x1xf32>
    %94 = arith.maximumf %92, %93 : vector<8x1xf32>
    %cst_29 = arith.constant 9.99999993E-9 : f32
    %95 = vector.broadcast %cst_29 : f32 to vector<8x1xf32>
    %96 = arith.addf %94, %95 : vector<8x1xf32>
    %97 = math.rsqrt %96 : vector<8x1xf32>
    %c0_30 = arith.constant 0 : index
    %c0_31 = arith.constant 0 : index
    %c0_32 = arith.constant 0 : index
    %98 = vector.load %arg4[%c0_30, %c0_31, %c0_32] : memref<1x8x1xf32, #tpu.memory_space<vmem>>, vector<1x8x1xf32>
    %99 = vector.shape_cast %98 : vector<1x8x1xf32> to vector<8x1xf32>
    %100 = arith.mulf %99, %97 : vector<8x1xf32>
    %c0_33 = arith.constant 0 : index
    %c0_34 = arith.constant 0 : index
    %c0_35 = arith.constant 0 : index
    %101 = vector.load %arg5[%c0_33, %c0_34, %c0_35] : memref<1x8x1xf32, #tpu.memory_space<vmem>>, vector<1x8x1xf32>
    %102 = vector.shape_cast %101 : vector<1x8x1xf32> to vector<8x1xf32>
    %103 = arith.mulf %100, %88 : vector<8x1xf32>
    %104 = arith.subf %102, %103 : vector<8x1xf32>
    %105 = vector.broadcast %100 : vector<8x1xf32> to vector<8x1024xf32>
    %106 = arith.mulf %105, %81 : vector<8x1024xf32>
    %107 = vector.broadcast %104 : vector<8x1xf32> to vector<8x1024xf32>
    %108 = arith.addf %106, %107 : vector<8x1024xf32>
    %c33_i32_36 = arith.constant 33 : i32
    %109 = tpu.dynamic_rotate %108 by %c33_i32_36 dim 1 : vector<8x1024xf32>, i32 -> vector<8x1024xf32>
    %cst_37 = arith.constant 0.000000e+00 : f32
    %110 = vector.shape_cast %25 : vector<1x1024xi1> to vector<1x1024xi1>
    %111 = vector.broadcast %110 : vector<1x1024xi1> to vector<8x1024xi1>
    %112 = vector.broadcast %cst_37 : f32 to vector<8x1024xf32>
    %113 = arith.select %111, %109, %112 : vector<8x1024xi1>, vector<8x1024xf32>
    %c32_i32_38 = arith.constant 32 : i32
    %114 = tpu.dynamic_rotate %108 by %c32_i32_38 dim 1 : vector<8x1024xf32>, i32 -> vector<8x1024xf32>
    %cst_39 = arith.constant 0.000000e+00 : f32
    %115 = vector.shape_cast %18 : vector<1x1024xi1> to vector<1x1024xi1>
    %116 = vector.broadcast %115 : vector<1x1024xi1> to vector<8x1024xi1>
    %117 = vector.broadcast %cst_39 : f32 to vector<8x1024xf32>
    %118 = arith.select %116, %114, %117 : vector<8x1024xi1>, vector<8x1024xf32>
    %c31_i32_40 = arith.constant 31 : i32
    %119 = tpu.dynamic_rotate %108 by %c31_i32_40 dim 1 : vector<8x1024xf32>, i32 -> vector<8x1024xf32>
    %cst_41 = arith.constant 0.000000e+00 : f32
    %120 = vector.shape_cast %26 : vector<1x1024xi1> to vector<1x1024xi1>
    %121 = vector.broadcast %120 : vector<1x1024xi1> to vector<8x1024xi1>
    %122 = vector.broadcast %cst_41 : f32 to vector<8x1024xf32>
    %123 = arith.select %121, %119, %122 : vector<8x1024xi1>, vector<8x1024xf32>
    %c1_i32_42 = arith.constant 1 : i32
    %124 = tpu.dynamic_rotate %108 by %c1_i32_42 dim 1 : vector<8x1024xf32>, i32 -> vector<8x1024xf32>
    %cst_43 = arith.constant 0.000000e+00 : f32
    %125 = vector.shape_cast %22 : vector<1x1024xi1> to vector<1x1024xi1>
    %126 = vector.broadcast %125 : vector<1x1024xi1> to vector<8x1024xi1>
    %127 = vector.broadcast %cst_43 : f32 to vector<8x1024xf32>
    %128 = arith.select %126, %124, %127 : vector<8x1024xi1>, vector<8x1024xf32>
    %c1023_i32_44 = arith.constant 1023 : i32
    %129 = tpu.dynamic_rotate %108 by %c1023_i32_44 dim 1 : vector<8x1024xf32>, i32 -> vector<8x1024xf32>
    %cst_45 = arith.constant 0.000000e+00 : f32
    %130 = vector.shape_cast %24 : vector<1x1024xi1> to vector<1x1024xi1>
    %131 = vector.broadcast %130 : vector<1x1024xi1> to vector<8x1024xi1>
    %132 = vector.broadcast %cst_45 : f32 to vector<8x1024xf32>
    %133 = arith.select %131, %129, %132 : vector<8x1024xi1>, vector<8x1024xf32>
    %c993_i32_46 = arith.constant 993 : i32
    %134 = tpu.dynamic_rotate %108 by %c993_i32_46 dim 1 : vector<8x1024xf32>, i32 -> vector<8x1024xf32>
    %cst_47 = arith.constant 0.000000e+00 : f32
    %135 = vector.shape_cast %27 : vector<1x1024xi1> to vector<1x1024xi1>
    %136 = vector.broadcast %135 : vector<1x1024xi1> to vector<8x1024xi1>
    %137 = vector.broadcast %cst_47 : f32 to vector<8x1024xf32>
    %138 = arith.select %136, %134, %137 : vector<8x1024xi1>, vector<8x1024xf32>
    %c992_i32_48 = arith.constant 992 : i32
    %139 = tpu.dynamic_rotate %108 by %c992_i32_48 dim 1 : vector<8x1024xf32>, i32 -> vector<8x1024xf32>
    %cst_49 = arith.constant 0.000000e+00 : f32
    %140 = vector.shape_cast %20 : vector<1x1024xi1> to vector<1x1024xi1>
    %141 = vector.broadcast %140 : vector<1x1024xi1> to vector<8x1024xi1>
    %142 = vector.broadcast %cst_49 : f32 to vector<8x1024xf32>
    %143 = arith.select %141, %139, %142 : vector<8x1024xi1>, vector<8x1024xf32>
    %c991_i32_50 = arith.constant 991 : i32
    %144 = tpu.dynamic_rotate %108 by %c991_i32_50 dim 1 : vector<8x1024xf32>, i32 -> vector<8x1024xf32>
    %cst_51 = arith.constant 0.000000e+00 : f32
    %145 = vector.shape_cast %28 : vector<1x1024xi1> to vector<1x1024xi1>
    %146 = vector.broadcast %145 : vector<1x1024xi1> to vector<8x1024xi1>
    %147 = vector.broadcast %cst_51 : f32 to vector<8x1024xf32>
    %148 = arith.select %146, %144, %147 : vector<8x1024xi1>, vector<8x1024xf32>
    %149 = tpu.concatenate %113, %118, %123, %128, %108, %133, %138, %143, %148 in 0 : vector<8x1024xf32>, vector<8x1024xf32>, vector<8x1024xf32>, vector<8x1024xf32>, vector<8x1024xf32>, vector<8x1024xf32>, vector<8x1024xf32>, vector<8x1024xf32>, vector<8x1024xf32> -> vector<72x1024xf32>
    %c0_52 = arith.constant 0 : index
    %c0_53 = arith.constant 0 : index
    %150 = vector.load %arg6[%c0_52, %c0_53] : memref<8x72xf32, #tpu.memory_space<vmem>>, vector<8x72xf32>
    %cst_54 = arith.constant dense<0.000000e+00> : vector<8x1024xf32>
    %151 = tpu.matmul %150, %149, %cst_54 {dimension_numbers = #tpu.dot_dimension_numbers<[1], [0], [0], [1], [0, 0, 1, 1], [], []>} : vector<8x72xf32>, vector<72x1024xf32>, vector<8x1024xf32> -> vector<8x1024xf32>
    %c0_55 = arith.constant 0 : index
    %c0_56 = arith.constant 0 : index
    %152 = vector.load %arg7[%c0_55, %c0_56] : memref<8x1xf32, #tpu.memory_space<vmem>>, vector<8x1xf32>
    %153 = vector.broadcast %152 : vector<8x1xf32> to vector<8x1024xf32>
    %154 = arith.addf %151, %153 : vector<8x1024xf32>
    %cst_57 = arith.constant 0.000000e+00 : f32
    %155 = vector.broadcast %cst_57 : f32 to vector<8x1024xf32>
    %156 = arith.cmpf ogt, %154, %155 : vector<8x1024xf32>
    %cst_58 = arith.constant 2.000000e-01 : f32
    %157 = vector.broadcast %cst_58 : f32 to vector<8x1024xf32>
    %158 = arith.mulf %157, %154 : vector<8x1024xf32>
    %159 = arith.select %156, %154, %158 : vector<8x1024xi1>, vector<8x1024xf32>
    %cst_59 = arith.constant dense<0.000000e+00> : vector<8xf32>
    %160 = vector.multi_reduction <add>, %159, %cst_59 [1] : vector<8x1024xf32> to vector<8xf32>
    %161 = vector.shape_cast %160 : vector<8xf32> to vector<8x1xf32>
    %162 = arith.mulf %159, %159 : vector<8x1024xf32>
    %cst_60 = arith.constant dense<0.000000e+00> : vector<8xf32>
    %163 = vector.multi_reduction <add>, %162, %cst_60 [1] : vector<8x1024xf32> to vector<8xf32>
    %164 = vector.shape_cast %163 : vector<8xf32> to vector<8x1xf32>
    %cst_61 = arith.constant 9.765625E-4 : f32
    %165 = vector.broadcast %cst_61 : f32 to vector<8x1xf32>
    %166 = arith.mulf %161, %165 : vector<8x1xf32>
    %cst_62 = arith.constant 9.765625E-4 : f32
    %167 = vector.broadcast %cst_62 : f32 to vector<8x1xf32>
    %168 = arith.mulf %164, %167 : vector<8x1xf32>
    %169 = arith.mulf %166, %166 : vector<8x1xf32>
    %170 = arith.subf %168, %169 : vector<8x1xf32>
    %cst_63 = arith.constant 0.000000e+00 : f32
    %171 = vector.broadcast %cst_63 : f32 to vector<8x1xf32>
    %172 = arith.maximumf %170, %171 : vector<8x1xf32>
    %cst_64 = arith.constant 9.99999993E-9 : f32
    %173 = vector.broadcast %cst_64 : f32 to vector<8x1xf32>
    %174 = arith.addf %172, %173 : vector<8x1xf32>
    %175 = math.rsqrt %174 : vector<8x1xf32>
    %c0_65 = arith.constant 0 : index
    %c0_66 = arith.constant 0 : index
    %c0_67 = arith.constant 0 : index
    %176 = vector.load %arg8[%c0_65, %c0_66, %c0_67] : memref<1x8x1xf32, #tpu.memory_space<vmem>>, vector<1x8x1xf32>
    %177 = vector.shape_cast %176 : vector<1x8x1xf32> to vector<8x1xf32>
    %178 = arith.mulf %177, %175 : vector<8x1xf32>
    %c0_68 = arith.constant 0 : index
    %c0_69 = arith.constant 0 : index
    %c0_70 = arith.constant 0 : index
    %179 = vector.load %arg9[%c0_68, %c0_69, %c0_70] : memref<1x8x1xf32, #tpu.memory_space<vmem>>, vector<1x8x1xf32>
    %180 = vector.shape_cast %179 : vector<1x8x1xf32> to vector<8x1xf32>
    %181 = arith.mulf %178, %166 : vector<8x1xf32>
    %182 = arith.subf %180, %181 : vector<8x1xf32>
    %183 = vector.broadcast %178 : vector<8x1xf32> to vector<8x1024xf32>
    %184 = arith.mulf %183, %159 : vector<8x1024xf32>
    %185 = vector.broadcast %182 : vector<8x1xf32> to vector<8x1024xf32>
    %186 = arith.addf %184, %185 : vector<8x1024xf32>
    %c0_71 = arith.constant 0 : index
    %c0_72 = arith.constant 0 : index
    %c0_73 = arith.constant 0 : index
    %187 = vector.load %arg10[%c0_71, %c0_72, %c0_73] : memref<1x8x1024xf32, #tpu.memory_space<vmem>>, vector<1x8x1024xf32>
    %188 = vector.shape_cast %187 : vector<1x8x1024xf32> to vector<8x1024xf32>
    %189 = vector.shape_cast %186 : vector<8x1024xf32> to vector<1x8x1024xf32>
    tpu.vector_store %arg10[%c0_71, %c0_72, %c0_73], %189 {strides = array<i32>} : memref<1x8x1024xf32, #tpu.memory_space<vmem>>, vector<1x8x1024xf32>,
    return
  }
  func.func @transform_0(%arg0: i32) -> (i32, i32, i32) {
    %c0_i32 = arith.constant 0 : i32
    %c0_i32_0 = arith.constant 0 : i32
    %c0_i32_1 = arith.constant 0 : i32
    return %arg0, %c0_i32, %c0_i32_0 : i32, i32, i32
  }
  func.func @transform_1(%arg0: i32) -> (i32, i32) {
    %c0_i32 = arith.constant 0 : i32
    %c0_i32_0 = arith.constant 0 : i32
    %c0_i32_1 = arith.constant 0 : i32
    return %c0_i32, %c0_i32_0 : i32, i32
  }
  func.func @transform_2(%arg0: i32) -> (i32, i32) {
    %c0_i32 = arith.constant 0 : i32
    %c0_i32_0 = arith.constant 0 : i32
    %c0_i32_1 = arith.constant 0 : i32
    return %c0_i32, %c0_i32_0 : i32, i32
  }
  func.func @transform_3(%arg0: i32) -> (i32, i32, i32) {
    %c0_i32 = arith.constant 0 : i32
    %c0_i32_0 = arith.constant 0 : i32
    %c0_i32_1 = arith.constant 0 : i32
    return %arg0, %c0_i32, %c0_i32_0 : i32, i32, i32
  }
  func.func @transform_4(%arg0: i32) -> (i32, i32, i32) {
    %c0_i32 = arith.constant 0 : i32
    %c0_i32_0 = arith.constant 0 : i32
    %c0_i32_1 = arith.constant 0 : i32
    return %arg0, %c0_i32, %c0_i32_0 : i32, i32, i32
  }
  func.func @transform_5(%arg0: i32) -> (i32, i32) {
    %c0_i32 = arith.constant 0 : i32
    %c0_i32_0 = arith.constant 0 : i32
    %c0_i32_1 = arith.constant 0 : i32
    return %c0_i32, %c0_i32_0 : i32, i32
  }
  func.func @transform_6(%arg0: i32) -> (i32, i32) {
    %c0_i32 = arith.constant 0 : i32
    %c0_i32_0 = arith.constant 0 : i32
    %c0_i32_1 = arith.constant 0 : i32
    return %c0_i32, %c0_i32_0 : i32, i32
  }
  func.func @transform_7(%arg0: i32) -> (i32, i32, i32) {
    %c0_i32 = arith.constant 0 : i32
    %c0_i32_0 = arith.constant 0 : i32
    %c0_i32_1 = arith.constant 0 : i32
    return %arg0, %c0_i32, %c0_i32_0 : i32, i32, i32
  }
  func.func @transform_8(%arg0: i32) -> (i32, i32, i32) {
    %c0_i32 = arith.constant 0 : i32
    %c0_i32_0 = arith.constant 0 : i32
    %c0_i32_1 = arith.constant 0 : i32
    return %arg0, %c0_i32, %c0_i32_0 : i32, i32, i32
  }
  func.func @transform_9(%arg0: i32) -> (i32, i32, i32) {
    %c0_i32 = arith.constant 0 : i32
    %c0_i32_0 = arith.constant 0 : i32
    %c0_i32_1 = arith.constant 0 : i32
    return %arg0, %c0_i32, %c0_i32_0 : i32, i32, i32
  }
}

</mosaic_0001>

<bundles_post_ra>
// kernel: decoder_block_forward.1
= control target key start
LH: loop header
LB: loop body
LE: loop exit
PB: predicated region body
PF: predicated region fallthrough
CT: control target
= control target key end

     0   :  { %s5172_s0 = inlined_call_operand.hbm [shape: f32[2,8,1024], index: 0, kind: input, shape index: {}]   ;;  %s5173_s1 = inlined_call_operand.hbm [shape: f32[8,72], index: 1, kind: input, shape index: {}]   ;;  %s5174_s2 = inlined_call_operand.hbm [shape: f32[8,1], index: 2, kind: input, shape index: {}]   ;;  %s5175_s3 = inlined_call_operand.hbm [shape: f32[2,8,1], index: 3, kind: input, shape index: {}]   ;;  %s5176_s4 = inlined_call_operand.hbm [shape: f32[2,8,1], index: 4, kind: input, shape index: {}]   ;;  %s5177_s5 = inlined_call_operand.hbm [shape: f32[8,72], index: 5, kind: input, shape index: {}]   ;;  %s5178_s6 = inlined_call_operand.hbm [shape: f32[8,1], index: 6, kind: input, shape index: {}]   ;;  %s5179_s7 = inlined_call_operand.hbm [shape: f32[2,8,1], index: 7, kind: input, shape index: {}]   ;;  %s5180_s8 = inlined_call_operand.hbm [shape: f32[2,8,1], index: 8, kind: input, shape index: {}]   ;;  %s5181_s9 = inlined_call_operand.hbm [shape: f32[2,8,1024], index: 9, kind: output, shape index: {}]  }
   0x1   :  { %5288 = sst [smem:[#allocation40_spill]] %s5173_s1 }
   0x2   :  { %5289 = sst [smem:[#allocation41_spill]] %s5175_s3 }
   0x3   :  { %5290 = sst [smem:[#allocation42_spill]] %s5177_s5 }
   0x4   :  { %5291 = sst [smem:[#allocation43_spill]] %s5179_s7 }
   0x5   :  { %5292 = sst [smem:[#allocation44_spill]] %s5181_s9 }
   0x6   :  { %14 = vsyncpa [#allocation3], 0 }
   0x7   :  { %16 = vsyncpa [#allocation3 + $0x1], 0 }
   0x8   :  { %17 = vsyncpa [#allocation6], 0 }
   0x9   :  { %18 = vsyncpa [#allocation9], 0 }
   0xa   :  { %20 = vsyncpa [#allocation9 + $0x1], 0 }
   0xb   :  { %21 = vsyncpa [#allocation12], 0 }
   0xc   :  { %22 = vsyncpa [#allocation15], 0 }
   0xd   :  { %24 = vsyncpa [#allocation15 + $0x1], 0 }
   0xe   :  { %25 = vsyncpa [#allocation4], 0 }
   0xf   :  { %27 = vsyncpa [#allocation4 + $0x1], 0  ;;  %s3475_s30 = smov 0   ;;  %s3477_s10 = smov 0  }
  0x10   :  { %s3479_s11 = smov 0   ;;  %s3481_s12 = smov 0  }
  0x11 LB: > { %5293 = sst [smem:[#allocation24_spill]] %s3390_s30  ;;  %s3496_s13 = sadd.s32 4294967295, %s3402_s12   ;;  %s3402_s12 = sphi %s3481_s12, %s5593_s12   ;;  %s3398_s11 = sphi %s3479_s11, %s5595_s11   ;;  %s3394_s10 = sphi %s3477_s10, %s5597_s10   ;;  %s3390_s30 = sphi %s3475_s30, %s5596_s30  }
  0x12   : > { %5294 = sst [smem:[#allocation25_spill]] %s3398_s11  ;;  %s2348_s14 = sadd.s32 4294967294, %s3402_s12  }
  0x13   : > { %5295 = sst [smem:[#allocation26_spill]] %s3496_s13  ;;  %p53_p0 = scmp.ne.s32.totalorder %s3394_s10, %s3390_s30 }
  0x14   : > { %p5182_p1 = scmp.eq.s32.totalorder %s3496_s13, 0  ;;  %p271_p3 = scmp.eq.s32.totalorder %s2348_s14, 1 }
  0x15   : > { %p2349_p5 = scmp.ge.s32.totalorder %s3402_s12, 1  ;;  %p278_p7 = scmp.lt.s32.totalorder %s3402_s12, 3 }
  0x16   : > { %p3505_p4 = por %p5182_p1, %p53_p0  ;;  %p3510_p6 = por %p271_p3, %p53_p0 }
  0x17   : > { %p3515_p8 = pnand %p2349_p5, %p278_p7  ;;  %s3404_s18 = smov [#allocation5]  }
  0x18   : > { %s5296_s15 = scalar_select %p3505_p4, 1, 0 }
  0x19   : > { %s5297_s16 = scalar_select %p3510_p6, 1, 0 }
  0x1a   : > { %s5299_s17 = scalar_select %p3515_p8, 1, 0 }
  0x1b   : > { %5298 = sst [smem:[#allocation27_spill]] %s5297_s16  ;;  %s291_s19 = sshll.u32 %s3404_s18, 4  ;;  %s292_s19 = int_to_ptr.vmem [resolvable:$true] %s291_s19 }
  0x1c   : > { %p2712_p10 = pneg %p3515_p8  ;;  %s3405_s20 = smov [#allocation11]  }
  0x1d   : > { %s313_s21 = sshll.u32 %s3405_s20, 4  ;;  %s3531_s23 = sadd.s32 1, %s3402_s12   ;;  %s3528_s21 = int_to_ptr.vmem [resolvable:$true] %s313_s21 }
  0x1e   : > { %p3524_p11 = pnand %p2712_p10, %p5182_p1  ;;  %5301 = sst [smem:[#allocation28_spill]] %s3531_s23 }
  0x1f   : > { %s5302_s1 = sld [smem:[#allocation40_spill]] }
  0x20   : > { %s5300_s22 = scalar_select %p3524_p11, 1, 0 }
  0x21   : > { %p3543_p13 = pneg %p3524_p11 }
  0x23   : > { %s5303_s14 = scalar_select %p3543_p13, 1, 0 }
  0x25   : > { %s3058_s27 = scalar_lea.hbm %s5302_s1, 128 }
  0x26   : > { %p3059_p12 = scmp.ne.s32.totalorder %s5302_s1, %s3058_s27  ;;  %p3065_p5 = scmp.lt.u32.totalorder %s3058_s27, %s5302_s1 }
  0x28   : > { %p3061_p0 = pnand %p3543_p13, %p3059_p12 }
  0x2a   : > { %p3062_p3 = pneg %p3061_p0 }
  0x2c   : > { %p3067_p7 = pnand %p3065_p5, %p3062_p3 }
  0x2e   : > { %3070 = shalt.err (!%p3067_p7)
}
  0x2f   : > { %s3071_s25 = scalar_lea.vmem %s292_s19, 128  ;;  %p3079_p2 = scmp.lt.s32.totalorder %s292_s19, %s292_s19 }
  0x30   : > { %p3072_p10 = scmp.ne.s32.totalorder %s292_s19, %s3071_s25  ;;  %p3080_p6 = scmp.lt.s32.totalorder %s3071_s25, %s3071_s25 }
  0x32   : > { %p3074_p9 = pnand %p3072_p10, %p3543_p13  ;;  %p3081_p4 = por %p3080_p6, %p3079_p2 }
  0x34   : > { %p3075_p1 = pneg %p3074_p9 }
  0x36   : > { %p3082_p8 = pnand %p3081_p4, %p3075_p1 }
  0x38   : > { %3085 = shalt.err (!%p3082_p8)
}
  0x39   : > { %2715 = dma.hbm_to_vmem [thread:$0]  (!%p3524_p11), %s5302_s1, 128, %s292_s19, [#allocation6]  }
  0x3a   : > { %s5304_s5 = sld [smem:[#allocation42_spill]] }
  0x40   : > { %s3086_s18 = scalar_lea.hbm %s5304_s5, 128 }
  0x41   : > { %p3087_p9 = scmp.ne.s32.totalorder %s5304_s5, %s3086_s18  ;;  %p3093_p1 = scmp.lt.u32.totalorder %s3086_s18, %s5304_s5 }
  0x43   : > { %p3089_p12 = pnand %p3087_p9, %p3543_p13 }
  0x45   : > { %p3090_p2 = pneg %p3089_p12 }
  0x47   : > { %p3095_p4 = pnand %p3093_p1, %p3090_p2 }
  0x49   : > { %3098 = shalt.err (!%p3095_p4)
}
  0x4a   : > { %s3099_s19 = scalar_lea.vmem %s3528_s21, 128  ;;  %p3107_p3 = scmp.lt.s32.totalorder %s3528_s21, %s3528_s21 }
  0x4b   : > { %p3100_p6 = scmp.ne.s32.totalorder %s3528_s21, %s3099_s19  ;;  %p3108_p5 = scmp.lt.s32.totalorder %s3099_s19, %s3099_s19 }
  0x4d   : > { %p3102_p8 = pnand %p3100_p6, %p3543_p13  ;;  %p3109_p7 = por %p3108_p5, %p3107_p3 }
  0x4f   : > { %p3103_p0 = pneg %p3102_p8 }
  0x51   : > { %p3110_p10 = pnand %p3109_p7, %p3103_p0 }
  0x53   : > { %3113 = shalt.err (!%p3110_p10)
}
  0x54   : > { %2721 = dma.hbm_to_vmem [thread:$0]  (!%p3524_p11), %s5304_s5, 128, %s3528_s21, [#allocation12]  }
  0x55   : > { %s5305_s26 = ssub.s32 %s3402_s12, %s3531_s23  ;;  %s40_s28 = sadd.s32 1, %s3398_s11 }
  0x56   : > { %p38_p9 = scmp.eq.s32.totalorder %s5305_s26, 0  ;;  %p47_p12 = scmp.ne.s32.totalorder %s3398_s11, %s3394_s10 }
  0x57   : > { %p48_p2 = scmp.eq.s32.totalorder %s3402_s12, 0  ;;  %p5307_p4 = scmp.eq.s32.totalorder %s3496_s13, 1 }
  0x58   : > { %s3590_s27 = scalar_select %p38_p9, %s3398_s11, %s40_s28  }
  0x59   : > { %p49_p1 = por %p48_p2, %p47_p12  ;;  %p3594_p6 = por %p5307_p4, %p47_p12 }
  0x5a   : > { %5306 = sst [smem:[#allocation29_spill]] %s3590_s27  ;;  %p2749_p8 = scmp.lt.s32.totalorder %s3402_s12, 2 }
  0x5b   : > { %s5308_s29 = scalar_select %p3594_p6, 1, 0 }
  0x5c   : > { %s3600_s18 = sand.u32 1, %s3398_s11   ;;  %p3606_p0 = pnand %p2749_p8, %p49_p1 }
  0x5d   : > { %5309 = sst [smem:[#allocation30_spill]] %s5308_s29  ;;  %s3604_s21 = sshll.u32 %s3600_s18, 3 }
  0x5e   : > { %s5310_s25 = scalar_select %p3606_p0, 1, 0 }
  0x5f   : > { %s3611_s19 = sshll.u32 %s3402_s12, 7  ;;  %s5311_s3 = sld [smem:[#allocation41_spill]] }
  0x60   : > { %s358_s28 = scalar_lea.vmem [#allocation8], %s3604_s21  ;;  %s5312_s1 = sand.u32 1, %s3402_s12  }
  0x61   : > { %s365_s20 = sshll.u32 %s358_s28, 4  ;;  %s3624_s5 = scalar_lea.sflag [#allocation9], %s5312_s1  ;;  %s3620_s20 = int_to_ptr.vmem [resolvable:$true] %s365_s20 }
  0x62   : > { %p3630_p5 = pneg %p3606_p0 }
  0x64   : > { %s5313_s11 = scalar_select %p3630_p5, 1, 0 }
  0x65   : > { %s3617_s26 = scalar_lea.hbm %s5311_s3, %s3611_s19  ;;  %s3119_s28 = scalar_lea.hbm %s5311_s3, 256 }
  0x66   : > { %s3114_s27 = scalar_lea.hbm %s3617_s26, 128  ;;  %p3120_p9 = scmp.lt.u32.totalorder %s3617_s26, %s5311_s3 }
  0x67   : > { %p3115_p3 = scmp.ne.s32.totalorder %s3617_s26, %s3114_s27  ;;  %p3121_p12 = scmp.lt.u32.totalorder %s3119_s28, %s3114_s27 }
  0x68   : > { %p3123_p1 = scmp.lt.u32.totalorder %s3114_s27, %s3617_s26 }
  0x69   : > { %p3117_p7 = pnand %p3630_p5, %p3115_p3  ;;  %p3122_p2 = por %p3121_p12, %p3120_p9 }
  0x6b   : > { %p3118_p10 = pneg %p3117_p7  ;;  %p3124_p4 = por %p3123_p1, %p3122_p2 }
  0x6d   : > { %p3125_p8 = pnand %p3124_p4, %p3118_p10 }
  0x6f   : > { %3128 = shalt.err (!%p3125_p8)
}
  0x70   : > { %s3129_s1 = scalar_lea.vmem %s3620_s20, 128  ;;  %s3406_s16 = smov [#allocation8]  }
  0x71   : > { %p3130_p3 = scmp.ne.s32.totalorder %s3620_s20, %s3129_s1  ;;  %s3134_s24 = sshll.u32 %s3406_s16, 4  ;;  %s3135_s24 = int_to_ptr.vmem [resolvable:$false] %s3134_s24 }
  0x72   : > { %s3136_s30 = scalar_lea.vmem %s3135_s24, 256  ;;  %p3137_p11 = scmp.lt.s32.totalorder %s3620_s20, %s3135_s24 }
  0x73   : > { %p3132_p7 = pnand %p3130_p3, %p3630_p5  ;;  %p3138_p13 = scmp.lt.s32.totalorder %s3136_s30, %s3129_s1 }
  0x75   : > { %p3133_p6 = pneg %p3132_p7  ;;  %p3139_p9 = por %p3138_p13, %p3137_p11 }
  0x77   : > { %p3140_p12 = pnand %p3139_p9, %p3133_p6 }
  0x79   : > { %3143 = shalt.err (!%p3140_p12)
}
  0x7a   : > { %2731 = dma.hbm_to_vmem [thread:$0]  (!%p3606_p0), %s3617_s26, 128, %s3620_s20, %s3624_s5  }
  0x7b   : > { %s5314_s7 = sld [smem:[#allocation43_spill]]  ;;  %s394_s1 = scalar_lea.vmem [#allocation14], %s3604_s21 }
  0x7c   : > { %s401_s16 = sshll.u32 %s394_s1, 4  ;;  %s5315_s24 = sand.u32 1, %s3402_s12   ;;  %s402_s16 = int_to_ptr.vmem [resolvable:$true] %s401_s16 }
  0x7d   : > { %s3663_s30 = scalar_lea.sflag [#allocation15], %s5315_s24 }
  0x81   : > { %s3658_s28 = scalar_lea.hbm %s5314_s7, %s3611_s19  ;;  %s3149_s23 = scalar_lea.hbm %s5314_s7, 256 }
  0x82   : > { %s3144_s3 = scalar_lea.hbm %s3658_s28, 128  ;;  %p3150_p10 = scmp.lt.u32.totalorder %s3658_s28, %s5314_s7 }
  0x83   : > { %p3145_p11 = scmp.ne.s32.totalorder %s3658_s28, %s3144_s3  ;;  %p3151_p2 = scmp.lt.u32.totalorder %s3149_s23, %s3144_s3 }
  0x84   : > { %p3153_p4 = scmp.lt.u32.totalorder %s3144_s3, %s3658_s28 }
  0x85   : > { %p3147_p13 = pnand %p3145_p11, %p3630_p5  ;;  %p3152_p1 = por %p3151_p2, %p3150_p10 }
  0x87   : > { %p3148_p6 = pneg %p3147_p13  ;;  %p3154_p8 = por %p3153_p4, %p3152_p1 }
  0x89   : > { %p3155_p3 = pnand %p3154_p8, %p3148_p6 }
  0x8b   : > { %3158 = shalt.err (!%p3155_p3)
}
  0x8c   : > { %s3159_s1 = scalar_lea.vmem %s402_s16, 128  ;;  %s3407_s24 = smov [#allocation14]  }
  0x8d   : > { %p3160_p7 = scmp.ne.s32.totalorder %s402_s16, %s3159_s1  ;;  %s3164_s29 = sshll.u32 %s3407_s24, 4  ;;  %s3165_s29 = int_to_ptr.vmem [resolvable:$false] %s3164_s29 }
  0x8e   : > { %s3166_s20 = scalar_lea.vmem %s3165_s29, 256  ;;  %p3167_p11 = scmp.lt.s32.totalorder %s402_s16, %s3165_s29 }
  0x8f   : > { %p3162_p9 = pnand %p3160_p7, %p3630_p5  ;;  %p3168_p13 = scmp.lt.s32.totalorder %s3166_s20, %s3159_s1 }
  0x91   : > { %p3163_p12 = pneg %p3162_p9  ;;  %p3169_p0 = por %p3168_p13, %p3167_p11 }
  0x93   : > { %p3170_p2 = pnand %p3169_p0, %p3163_p12 }
  0x95   : > { %3173 = shalt.err (!%p3170_p2)
}
  0x96   : > { %p5316_p10 = scmp.ne.s32.totalorder %s5310_s25, 0  ;;  %s3408_s3 = smov [#allocation7]  }
  0x97   : > { %s302_s9 = sshll.u32 %s3408_s3, 4  ;;  %s3409_s26 = smov [#allocation13]   ;;  %s303_s9 = int_to_ptr.vmem [resolvable:$true] %s302_s9 }
  0x98   : > { %2737 = dma.hbm_to_vmem [thread:$0]  (!%p5316_p10), %s3658_s28, 128, %s402_s16, %s3663_s30  }
  0x99   : > { %s324_s23 = sshll.u32 %s3409_s26, 4  ;;  %s3174_s7 = scalar_lea.hbm %s5174_s2, 128  ;;  %s325_s23 = int_to_ptr.vmem [resolvable:$true] %s324_s23 }
  0x9a   : > { %p3175_p0 = scmp.ne.s32.totalorder %s5174_s2, %s3174_s7  ;;  %p5317_p6 = scmp.ne.s32.totalorder %s5303_s14, 0 }
  0x9b   : > { %p3181_p8 = scmp.lt.u32.totalorder %s3174_s7, %s5174_s2 }
  0x9c   : > { %p3177_p1 = pnand %p3175_p0, %p5317_p6 }
  0x9e   : > { %p3178_p4 = pneg %p3177_p1 }
  0xa0   : > { %p3183_p3 = pnand %p3181_p8, %p3178_p4 }
  0xa2   : > { %3186 = shalt.err (!%p3183_p3)
}
  0xa3   : > { %s3187_s28 = scalar_lea.vmem %s303_s9, 128  ;;  %p3195_p11 = scmp.lt.s32.totalorder %s303_s9, %s303_s9 }
  0xa4   : > { %p3188_p7 = scmp.ne.s32.totalorder %s303_s9, %s3187_s28  ;;  %p3196_p13 = scmp.lt.s32.totalorder %s3187_s28, %s3187_s28 }
  0xa6   : > { %p3190_p9 = pnand %p3188_p7, %p5317_p6  ;;  %p3197_p2 = por %p3196_p13, %p3195_p11 }
  0xa8   : > { %p3191_p12 = pneg %p3190_p9 }
  0xaa   : > { %p3198_p10 = pnand %p3197_p2, %p3191_p12 }
  0xac   : > { %3201 = shalt.err (!%p3198_p10)
}
  0xad   : > { %p5318_p0 = scmp.ne.s32.totalorder %s5300_s22, 0  ;;  %s3202_s26 = scalar_lea.hbm %s5178_s6, 128 }
  0xae   : > { %p3203_p1 = scmp.ne.s32.totalorder %s5178_s6, %s3202_s26  ;;  %p3209_p10 = scmp.lt.u32.totalorder %s3202_s26, %s5178_s6 }
  0xaf   : > { %2718 = dma.hbm_to_vmem [thread:$0]  (!%p5318_p0), %s5174_s2, 128, %s303_s9, [#allocation6]  }
  0xb0   : > { %p3205_p4 = pnand %p3203_p1, %p5317_p6 }
  0xb2   : > { %p3206_p8 = pneg %p3205_p4 }
  0xb4   : > { %p3211_p3 = pnand %p3209_p10, %p3206_p8 }
  0xb6   : > { %3214 = shalt.err (!%p3211_p3)
}
  0xb7   : > { %s3215_s20 = scalar_lea.vmem %s325_s23, 128  ;;  %p3223_p11 = scmp.lt.s32.totalorder %s325_s23, %s325_s23 }
  0xb8   : > { %p3216_p7 = scmp.ne.s32.totalorder %s325_s23, %s3215_s20  ;;  %p3224_p13 = scmp.lt.s32.totalorder %s3215_s20, %s3215_s20 }
  0xba   : > { %p3218_p9 = pnand %p3216_p7, %p5317_p6  ;;  %p3225_p2 = por %p3224_p13, %p3223_p11 }
  0xbc   : > { %p3219_p12 = pneg %p3218_p9 }
  0xbe   : > { %p3226_p5 = pnand %p3225_p2, %p3219_p12 }
  0xc0   : > { %3229 = shalt.err (!%p3226_p5)
}
  0xc1   : > { %2724 = dma.hbm_to_vmem [thread:$0]  (!%p5318_p0), %s5178_s6, 128, %s325_s23, [#allocation12]  }
  0xc2   : > { %s2355_s16 = sshll.u32 %s3600_s18, 6  ;;  %s2490_s14 = sshll.u32 %s3402_s12, 10 }
  0xc3   : > { %s3724_s13 = scalar_lea.hbm %s5172_s0, %s2490_s14  ;;  %s339_s22 = scalar_lea.vmem [#allocation2], %s2355_s16 }
  0xc4   : > { %s347_s26 = sshll.u32 %s339_s22, 4  ;;  %s3732_s29 = scalar_lea.hbm %s5176_s4, %s3611_s19  ;;  %s3726_s26 = int_to_ptr.vmem [resolvable:$true] %s347_s26 }
  0xc5   : > { %s336_s23 = scalar_lea.sflag [#allocation3], %s3600_s18  ;;  %s3230_s1 = scalar_lea.hbm %s3724_s13, 1024 }
  0xc6   : > { %p3231_p5 = scmp.ne.s32.totalorder %s3724_s13, %s3230_s1  ;;  %p5319_p6 = scmp.ne.s32.totalorder %s5313_s11, 0 }
  0xc7   : > { %s3235_s28 = scalar_lea.hbm %s5172_s0, 2048  ;;  %p3236_p4 = scmp.lt.u32.totalorder %s3724_s13, %s5172_s0 }
  0xc8   : > { %p3233_p0 = pnand %p3231_p5, %p5319_p6  ;;  %p3237_p8 = scmp.lt.u32.totalorder %s3235_s28, %s3230_s1 }
  0xc9   : > { %p3239_p3 = scmp.lt.u32.totalorder %s3230_s1, %s3724_s13 }
  0xca   : > { %p3234_p1 = pneg %p3233_p0  ;;  %p3238_p10 = por %p3237_p8, %p3236_p4 }
  0xcc   : > { %p3240_p7 = por %p3239_p3, %p3238_p10 }
  0xce   : > { %p3241_p9 = pnand %p3240_p7, %p3234_p1 }
  0xd0   : > { %3244 = shalt.err (!%p3241_p9)
}
  0xd1   : > { %s3245_s18 = scalar_lea.vmem %s3726_s26, 1024  ;;  %s3410_s3 = smov [#allocation2]  }
  0xd2   : > { %p3246_p12 = scmp.ne.s32.totalorder %s3726_s26, %s3245_s18  ;;  %s3250_s7 = sshll.u32 %s3410_s3, 4  ;;  %s3251_s7 = int_to_ptr.vmem [resolvable:$false] %s3250_s7 }
  0xd3   : > { %s3252_s22 = scalar_lea.vmem %s3251_s7, 2048  ;;  %p3253_p2 = scmp.lt.s32.totalorder %s3726_s26, %s3251_s7 }
  0xd4   : > { %p3248_p11 = pnand %p3246_p12, %p5319_p6  ;;  %p3254_p5 = scmp.lt.s32.totalorder %s3252_s22, %s3245_s18 }
  0xd6   : > { %p3249_p13 = pneg %p3248_p11  ;;  %p3255_p0 = por %p3254_p5, %p3253_p2 }
  0xd8   : > { %p3256_p4 = pnand %p3255_p0, %p3249_p13 }
  0xda   : > { %3259 = shalt.err (!%p3256_p4)
}
  0xdb   : > { %p5320_p1 = scmp.ne.s32.totalorder %s5310_s25, 0  ;;  %s376_s27 = scalar_lea.vmem [#allocation10], %s3604_s21 }
  0xdc   : > { %s383_s24 = sshll.u32 %s376_s27, 4  ;;  %s3761_s9 = scalar_lea.hbm %s5180_s8, %s3611_s19  ;;  %s384_s24 = int_to_ptr.vmem [resolvable:$true] %s383_s24 }
  0xdd   : > { %2728 = dma.hbm_to_vmem [thread:$0]  (!%p5320_p1), %s3724_s13, 1024, %s3726_s26, %s336_s23  }
  0xde   : > { %s3260_s28 = scalar_lea.hbm %s3732_s29, 128  ;;  %s3265_s18 = scalar_lea.hbm %s5176_s4, 256 }
  0xdf   : > { %p3261_p8 = scmp.ne.s32.totalorder %s3732_s29, %s3260_s28  ;;  %p3266_p7 = scmp.lt.u32.totalorder %s3732_s29, %s5176_s4 }
  0xe0   : > { %p3267_p9 = scmp.lt.u32.totalorder %s3265_s18, %s3260_s28  ;;  %p3269_p11 = scmp.lt.u32.totalorder %s3260_s28, %s3732_s29 }
  0xe1   : > { %p3263_p10 = pnand %p3261_p8, %p5319_p6 }
  0xe2   : > { %p3268_p12 = por %p3267_p9, %p3266_p7 }
  0xe3   : > { %p3264_p3 = pneg %p3263_p10 }
  0xe4   : > { %p3270_p13 = por %p3269_p11, %p3268_p12 }
  0xe6   : > { %p3271_p2 = pnand %p3270_p13, %p3264_p3 }
  0xe8   : > { %3274 = shalt.err (!%p3271_p2)
}
  0xe9   : > { %s3275_s19 = scalar_lea.vmem %s384_s24, 128  ;;  %s3411_s13 = smov [#allocation10]  }
  0xea   : > { %p3276_p5 = scmp.ne.s32.totalorder %s384_s24, %s3275_s19  ;;  %s3280_s26 = sshll.u32 %s3411_s13, 4  ;;  %s3281_s26 = int_to_ptr.vmem [resolvable:$false] %s3280_s26 }
  0xeb   : > { %s3282_s23 = scalar_lea.vmem %s3281_s26, 256  ;;  %p3283_p8 = scmp.lt.s32.totalorder %s384_s24, %s3281_s26 }
  0xec   : > { %p3278_p0 = pnand %p3276_p5, %p5319_p6  ;;  %p3284_p10 = scmp.lt.s32.totalorder %s3282_s23, %s3275_s19 }
  0xee   : > { %p3279_p4 = pneg %p3278_p0  ;;  %p3285_p1 = por %p3284_p10, %p3283_p8 }
  0xf0   : > { %p3286_p7 = pnand %p3285_p1, %p3279_p4 }
  0xf2   : > { %3289 = shalt.err (!%p3286_p7)
}
  0xf3   : > { %p5321_p9 = scmp.ne.s32.totalorder %s5310_s25, 0  ;;  %s412_s22 = scalar_lea.vmem [#allocation16], %s3604_s21 }
  0xf4   : > { %s419_s27 = sshll.u32 %s412_s22, 4  ;;  %s3290_s1 = scalar_lea.hbm %s3761_s9, 128  ;;  %s420_s27 = int_to_ptr.vmem [resolvable:$true] %s419_s27 }
  0xf5   : > { %2734 = dma.hbm_to_vmem [thread:$0]  (!%p5321_p9), %s3732_s29, 128, %s384_s24, %s3624_s5  }
  0xf6   : > { %p3291_p3 = scmp.ne.s32.totalorder %s3761_s9, %s3290_s1  ;;  %s3295_s14 = scalar_lea.hbm %s5180_s8, 256 }
  0xf7   : > { %p3296_p11 = scmp.lt.u32.totalorder %s3761_s9, %s5180_s8  ;;  %p3297_p13 = scmp.lt.u32.totalorder %s3295_s14, %s3290_s1 }
  0xf8   : > { %p3293_p12 = pnand %p3291_p3, %p5319_p6  ;;  %p3299_p5 = scmp.lt.u32.totalorder %s3290_s1, %s3761_s9 }
  0xf9   : > { %p3298_p2 = por %p3297_p13, %p3296_p11 }
  0xfa   : > { %p3294_p1 = pneg %p3293_p12 }
  0xfb   : > { %p3300_p0 = por %p3299_p5, %p3298_p2 }
  0xfd   : > { %p3301_p4 = pnand %p3300_p0, %p3294_p1 }
  0xff   : > { %3304 = shalt.err (!%p3301_p4)
}
 0x100   : > { %s3305_s5 = scalar_lea.vmem %s420_s27, 128  ;;  %s3412_s21 = smov [#allocation16]  }
 0x101   : > { %p3306_p8 = scmp.ne.s32.totalorder %s420_s27, %s3305_s5  ;;  %s3310_s29 = sshll.u32 %s3412_s21, 4  ;;  %s3311_s29 = int_to_ptr.vmem [resolvable:$false] %s3310_s29 }
 0x102   : > { %s3312_s24 = scalar_lea.vmem %s3311_s29, 256  ;;  %p3313_p3 = scmp.lt.s32.totalorder %s420_s27, %s3311_s29 }
 0x103   : > { %p3308_p10 = pnand %p3306_p8, %p5319_p6  ;;  %p3314_p12 = scmp.lt.s32.totalorder %s3312_s24, %s3305_s5 }
 0x105   : > { %p3309_p7 = pneg %p3308_p10  ;;  %p3315_p9 = por %p3314_p12, %p3313_p3 }
 0x107   : > { %p3316_p11 = pnand %p3315_p9, %p3309_p7 }
 0x109   : > { %3319 = shalt.err (!%p3316_p11)
}
 0x10a   : > { %p5322_p13 = scmp.ne.s32.totalorder %s5310_s25, 0  ;;  %p5323_p1 = scmp.ne.s32.totalorder %s5299_s17, 0 }
 0x10c   : > { %2740 = dma.hbm_to_vmem [thread:$0]  (!%p5322_p13), %s3761_s9, 128, %s420_s27, %s3663_s30  }
 0x10d   : > { %428 = sbr.rel (%p5323_p1) target bundleno = 1765 (0x6e5), region = 56 }
 0x114   : > { %s3803_s11 = sand.u32 1, %s3394_s10   ;;  %p5324_p6 = scmp.ne.s32.totalorder %s5296_s15, 0 }
 0x115   : > { %s2367_s3 = sshll.u32 %s3803_s11, 6  ;;  %s431_s7 = scalar_lea.sflag [#allocation3], %s3803_s11 }
 0x116   : > { %s3809_s19 = scalar_lea.vmem [#allocation2], %s2367_s3 }
 0x117   : > { %3365 = dma.done.wait (%p5324_p6), %s431_s7, 1024  }
 0x118   : > { %3367 = vsyncadd (%p5324_p6), %s431_s7, 4294966272  ;;  %s5325_s25 = sld [smem:[#allocation26_spill]] }
 0x11e   : > { %p5326_p9 = scmp.eq.s32.totalorder %s5325_s25, 0 }
 0x120   : > { %3369 = dma.done.wait (%p5326_p9), [#allocation6], 256   ;;  %p5327_p2 = pmov %p5326_p9 }
 0x121   : > { %s447_s17 = sand.u32 1, %s5325_s25   ;;  %s3821_s30 = sshll.u32 %s3803_s11, 3 }
 0x122   : > { %3371 = vsyncadd (%p5327_p2), [#allocation6], 4294967040  ;;  %s448_s9 = scalar_lea.sflag [#allocation9], %s447_s17  ;;  %s451_s13 = scalar_lea.vmem [#allocation8], %s3821_s30 }
 0x123   : > { %3373 = dma.done.wait (%p5324_p6), %s448_s9, 256  }
 0x124   : > { %3375 = vsyncadd (%p5324_p6), %s448_s9, 4294967040  ;;  %s460_s26 = scalar_lea.vmem [#allocation10], %s3821_s30  ;;  %p5328_p5 = pmov %p5327_p2 }
 0x125   : > { %p5329_p0 = pmov %p5327_p2 }
 0x126   : > { %3377 = dma.done.wait (%p5328_p5), [#allocation12], 256  }
 0x127   : > { %3379 = vsyncadd (%p5329_p0), [#allocation12], 4294967040  ;;  %s474_s23 = scalar_lea.sflag [#allocation15], %s447_s17  ;;  %s477_s22 = scalar_lea.vmem [#allocation14], %s3821_s30 }
 0x128   : > { %3381 = dma.done.wait (%p5324_p6), %s474_s23, 256  }
 0x129   : > { %3383 = vsyncadd (%p5324_p6), %s474_s23, 4294967040  ;;  %v3839_v0 = vld [vmem:[%s3809_s19 + $0x10] sm:$0xff]  ;;  %v3842_v1 = vld [vmem:[%s3809_s19 + $0x38] sm:$0xff]  ;;  %s3413_s15 = smov 33   ;;  %s3414_s27 = smov 32   ;;  %v5234_v14 = vmov 0.0   ;;  %v541_v17 = vlaneseq }
 0x12a   : > { %v3845_v2 = vld [vmem:[%s3809_s19] sm:$0xff]  ;;  %v2812_v3 = vpack.i.bf16 %v3839_v0, %v3842_v1  ;;  %v3850_v4 = vld [vmem:[%s3809_s19 + $0x8] sm:$0xff]  ;;  %v3857_v6 = vld [vmem:[%s3809_s19 + $0x18] sm:$0xff]  ;;  %s3415_s1 = smov 1   ;;  %s3416_s20 = smov 31   ;;  %1185 = vmatprep.mubr.f32.mxu0 %v5234_v14  ;;  %1256 = vmatprep.mubr.f32.mxu1 %v5234_v14  ;;  %v3422_v15 = vmov 0  }
 0x12b   : > { %v2802_v5 = vpack.i.bf16 %v3850_v4, %v3845_v2  ;;  %v3860_v7 = vld [vmem:[%s3809_s19 + $0x20] sm:$0xff]  ;;  %v2867_v9 = vpack.i.bf16 %v3857_v6, %v3845_v2  ;;  %v2862_v10 = vpack.i.bf16 %v3839_v0, %v3850_v4  ;;  %s3417_s28 = smov 127   ;;  %s3418_s14 = smov 97   ;;  %v3886_v11 = vld [vmem:[%s3809_s19 + $0x28] sm:$0xff]  ;;  %v3889_v12 = vld [vmem:[%s3809_s19 + $0x30] sm:$0xff]  ;;  %2928 = vset.pattern.permute.xlu0 %v3422_v15  ;;  %2927 = vset.pattern.permute.xlu1 %v3422_v15  ;;  %v3929_v18 = vand.u32 127, %v541_v17 }
 0x12c   : > { %2813 = vrot.lane.b32.xlu1 %v2812_v3, %s3413_s15  ;;  %v2827_v8 = vpack.i.bf16 %v3860_v7, %v3857_v6  ;;  %s3419_s16 = smov 96   ;;  %v2892_v13 = vpack.i.bf16 %v3889_v12, %v3886_v11  ;;  %s3421_s18 = smov 95   ;;  %v1111_v16 = vld [vmem:[#allocation7] sm:$0xff]  ;;  %v5330_v26 = vmov 0  ;;  %v5332_v34 = vmov 0 }
 0x12d   : > { %2803 = vrot.lane.b32.xlu0 %v2802_v5, %s3413_s15  ;;  %v543_v19 = vadd.s32 128, %v3929_v18  ;;  %v554_v20 = vand.u32 31, %v3929_v18  ;;  %v3934_v21 = vadd.s32 384, %v3929_v18  ;;  %v3939_v25 = vadd.s32 256, %v3929_v18  ;;  %s486_s5 = scalar_lea.vmem [#allocation16], %s3821_s30  ;;  %s2491_s21 = sshll.u32 %s5325_s25, 10 }
 0x12e   : > { %vm646_vm0 = vcmp.ge.s32.totalorder %v3929_v18, 32  ;;  %vm5205_vm2 = vcmp.lt.s32.totalorder %v3929_v18, 32  ;;  %vm5204_vm3 = vcmp.lt.s32.totalorder %v3929_v18, 33  ;;  %v5336_v40 = vmov 0  ;;  %s540_s29 = scalar_lea.vmem [#allocation17], %s2367_s3  ;;  %s5586_s7 = sld [smem:[#allocation30_spill]] }
 0x12f   : > { %v561_v24 = vand.u32 31, %v543_v19  ;;  %vm3942_vm1 = vcmp.ge.s32.totalorder %v554_v20, 1  ;;  %v575_v27 = vand.u32 31, %v3934_v21  ;;  %v568_v38 = vand.u32 31, %v3939_v25  ;;  %s2154_s24 = sshll.u32 %s540_s29, 4  ;;  %s5587_s17 = sld [smem:[#allocation44_spill]]  ;;  %s5130_s24 = int_to_ptr.vmem [resolvable:$true] %s2154_s24 }
 0x130   : > { %2818 = vrot.lane.b32.xlu1 %v2812_v3, %s3414_s27  ;;  %v5331_v26 = vsel %vm3942_vm1, 4294967295, %v5330_v26  ;;  %vm3961_vm5 = vmand %vm646_vm0, %vm3942_vm1  ;;  %vm5207_vm7 = vmmov 1   ;;  %v5338_v44 = vmov 0  ;;  %v5340_v52 = vmov 0  ;;  %s2140_s30 = scalar_lea.sflag [#allocation4], %s3803_s11  ;;  %s3320_s9 = scalar_lea.vmem %s5130_s24, 1024 }
 0x131   : > { %2808 = vrot.lane.b32.xlu0 %v2802_v5, %s3414_s27  ;;  %vm3953_vm4 = vcmp.ge.s32.totalorder %v561_v24, 1  ;;  %vm3969_vm6 = vcmp.ge.s32.totalorder %v575_v27, 1  ;;  %vm4002_vm9 = vmpackc.low %vm646_vm0, %vm3961_vm5  ;;  %vm4007_vm10 = vcmp.ge.s32.totalorder %v568_v38, 1  ;;  %v5342_v54 = vmov 0  ;;  %p3321_p4 = scmp.ne.s32.totalorder %s5130_s24, %s3320_s9 }
 0x132   : > { %v5333_v34 = vsel %vm3953_vm4, 4294967295, %v5332_v34  ;;  %v5337_v40 = vsel %vm3969_vm6, 4294967295, %v5336_v40  ;;  %vm3982_vm8 = vmpackc.low %vm5207_vm7, %vm3953_vm4  ;;  %v5341_v52 = vsel %vm4002_vm9, 4294967295, %v5340_v52  ;;  %v5343_v54 = vsel %vm4007_vm10, 4294967295, %v5342_v54 }
 0x133   : > { %v5339_v44 = vsel %vm3982_vm8, 4294967295, %v5338_v44  ;;  %vm5210_vm11 = vcmp.lt.s32.totalorder %v3929_v18, 1  ;;  %vm5212_vm12 = vcmp.lt.s32.totalorder %v3929_v18, 31  ;;  %vm4030_vm13 = vmpackc.low %vm5207_vm7, %vm3969_vm6  ;;  %v5344_v59 = vmov 0 }
 0x134   : > { %2828 = vrot.lane.b32.xlu1 %v2827_v8, %s3414_s27  ;;  %v5345_v59 = vsel %vm4030_vm13, 4294967295, %v5344_v59  ;;  %vm4034_vm14 = vcmp.le.s32.totalorder %v561_v24, 30  ;;  %v5346_v60 = vmov 0  ;;  %vm4043_vm15 = vmpackc.low %vm5207_vm7, %vm4007_vm10  ;;  %vm4047_vm5 = vcmp.le.s32.totalorder %v554_v20, 30  ;;  %p5588_p8 = scmp.ne.s32.totalorder %s5586_s7, 0 }
 0x135   : > { %2823 = vrot.lane.b32.xlu0 %v2827_v8, %s3413_s15  ;;  %v5347_v60 = vsel %vm4034_vm14, 4294967295, %v5346_v60  ;;  %v5350_v15 = vmov 0  ;;  %v5353_v25 = vmov 0  ;;  %vm4108_vm7 = vcmp.le.s32.totalorder %v568_v38, 30  ;;  %s5128_s3 = scalar_lea.hbm %s5587_s17, %s2491_s21 }
 0x136   : > { %v5351_v15 = vsel %vm4047_vm5, 4294967295, %v5350_v15  ;;  %p3322_p10 = pnand %p3321_p4, %p5588_p8 }
 0x137   : > { %5352 = vst [vmem:[#allocation31_spill] sm:$0xff] %v5351_v15 }
 0x138   : > { %2838 = vrot.lane.b32.xlu1 %v2802_v5, %s3415_s1  ;;  %p3323_p7 = pneg %p3322_p10 }
 0x139   : > { %2833 = vrot.lane.b32.xlu0 %v2802_v5, %s3416_s20 }
 0x13c   : > { %2848 = vrot.lane.b32.xlu1 %v2812_v3, %s3415_s1 }
 0x13d   : > { %2843 = vrot.lane.b32.xlu0 %v2812_v3, %s3416_s20 }
 0x140   : > { %2858 = vrot.lane.b32.xlu1 %v2827_v8, %s3415_s1 }
 0x141   : > { %2853 = vrot.lane.b32.xlu0 %v2827_v8, %s3416_s20  ;;  %v5348_v8 = vmov 0 }
 0x142   : > { %v5349_v8 = vsel %vm4043_vm15, 4294967295, %v5348_v8 }
 0x144   : > { %2868 = vrot.lane.b32.xlu1 %v2867_v9, %s3417_s28 }
 0x145   : > { %2863 = vrot.lane.b32.xlu0 %v2862_v10, %s3417_s28 }
 0x148   : > { %2873 = vrot.lane.b32.xlu1 %v2862_v10, %s3418_s14 }
 0x149   : > { %922 = vrot.lane.b32.xlu0 %v3860_v7, %s3417_s28 }
 0x14c   : > { %2883 = vrot.lane.b32.xlu1 %v2867_v9, %s3418_s14 }
 0x14d   : > { %2878 = vrot.lane.b32.xlu0 %v2862_v10, %s3419_s16 }
 0x150   : > { %971 = vrot.lane.b32.xlu1 %v3860_v7, %s3418_s14 }
 0x151   : > { %2888 = vrot.lane.b32.xlu0 %v2867_v9, %s3419_s16 }
 0x154   : > { %2893 = vrot.lane.b32.xlu1 %v2892_v13, %s3413_s15 }
 0x155   : > { %1020 = vrot.lane.b32.xlu0 %v3860_v7, %s3419_s16 }
 0x158   : > { %1063 = vrot.lane.b32.xlu1 %v3850_v4, %s3421_s18 }
 0x159   : > { %2898 = vrot.lane.b32.xlu0 %v2892_v13, %s3414_s27 }
 0x15c   : > { %1061 = vrot.lane.b32.xlu1 %v3845_v2, %s3421_s18 }
 0x15d   : > { %1065 = vrot.lane.b32.xlu0 %v3839_v0, %s3421_s18 }
 0x160   : > { %2908 = vrot.lane.b32.xlu1 %v2892_v13, %s3415_s1 }
 0x161   : > { %2903 = vrot.lane.b32.xlu0 %v2892_v13, %s3416_s20 }
 0x164   : > { %1069 = vrot.lane.b32.xlu1 %v3860_v7, %s3421_s18 }
 0x165   : > { %1067 = vrot.lane.b32.xlu0 %v3857_v6, %s3421_s18 }
 0x168   : > { %928 = vrot.lane.b32.xlu1 %v3842_v1, %s3417_s28 }
 0x169   : > { %2913 = vrot.lane.b32.xlu0 %v2892_v13, %s3417_s28 }
 0x16c   : > { %2923 = vrot.lane.b32.xlu1 %v2892_v13, %s3419_s16 }
 0x16d   : > { %2918 = vrot.lane.b32.xlu0 %v2892_v13, %s3418_s14 }
 0x170   : > { %1026 = vrot.lane.b32.xlu1 %v3842_v1, %s3419_s16 }
 0x171   : > { %977 = vrot.lane.b32.xlu0 %v3842_v1, %s3418_s14 }
 0x174   : > { %1073 = vrot.lane.b32.xlu1 %v3889_v12, %s3421_s18 }
 0x175   : > { %1071 = vrot.lane.b32.xlu0 %v3886_v11, %s3421_s18 }
 0x178   : > { %1114 = vperm.xlu1 %2927, %v1111_v16  }
 0x179   : > { %1075 = vrot.lane.b32.xlu0 %v3842_v1, %s3421_s18 }
 0x19e   : > { %v3936_v22 = vpop.permute.xlu1 %2813 }
 0x19f   : > { %v2804_v23 = vpop.permute.xlu0 %2803  ;;  %v5230_v28 = vunpack.i.l.bf16 %v3936_v22  ;;  %v2816_v47 = vunpack.i.h.bf16 %v3936_v22 }
 0x1a0   : > { %v2806_v29 = vunpack.i.h.bf16 %v2804_v23  ;;  %v2805_v30 = vunpack.i.l.bf16 %v2804_v23 }
 0x1a2   : > { %v3948_v31 = vpop.permute.xlu1 %2818  ;;  %v741_v42 = vsel %vm5204_vm3, %v2805_v30, %v2806_v29  ;;  %v742_v45 = vsel %vm5204_vm3, %v5230_v28, %v2805_v30  ;;  %v740_v5 = vsel %vm5204_vm3, %v2806_v29, %v2816_v47 }
 0x1a3   : > { %v5233_v32 = vunpack.i.l.bf16 %v3948_v31  ;;  %v2809_v33 = vpop.permute.xlu0 %2808  ;;  %v2821_v39 = vunpack.i.h.bf16 %v3948_v31 }
 0x1a4   : > { %v2811_v35 = vunpack.i.h.bf16 %v2809_v33  ;;  %v2810_v36 = vunpack.i.l.bf16 %v2809_v33 }
 0x1a6   : > { %v3973_v41 = vpop.permute.xlu1 %2828  ;;  %v790_v43 = vsel %vm5205_vm2, %v2810_v36, %v2811_v35  ;;  %v791_v46 = vsel %vm5205_vm2, %v5233_v32, %v2810_v36  ;;  %v789_v56 = vsel %vm5205_vm2, %v2811_v35, %v2821_v39 }
 0x1a7   : > { %v2830_v48 = vunpack.i.l.bf16 %v3973_v41  ;;  %v3996_v49 = vpop.permute.xlu0 %2823  ;;  %v2492_v50 = vpack.c.bf16 %v790_v43, %v741_v42  ;;  %v2495_v51 = vpack.c.bf16 %v791_v46, %v742_v45  ;;  %v2519_v13 = vpack.c.bf16 %v789_v56, %v740_v5 }
 0x1a8   : > { %v2825_v53 = vunpack.i.l.bf16 %v3996_v49  ;;  %v5355_v45 = vmov 0 }
 0x1a9   : > { %2494 = vmatprep.subr.msk.bf16.mxu0 %vm3982_vm8, %v2492_v50  ;;  %v788_v55 = vsel %vm5205_vm2, %v2821_v39, %v2830_v48  ;;  %vm4072_vm2 = vmand %vm646_vm0, %vm4047_vm5 }
 0x1aa   : > { %2497 = vmatpush1.bf16.msk.msra.mxu0 %vm4002_vm9, %v2495_v51  ;;  %v2839_v57 = vpop.permute.xlu1 %2838  ;;  %v739_v58 = vsel %vm5204_vm3, %v2816_v47, %v2825_v53  ;;  %vm5206_vm3 = vmpackc.low %vm3953_vm4, %vm4034_vm14  ;;  %v5354_v25 = vsel %vm4072_vm2, 4294967295, %v5353_v25  ;;  %v5357_v47 = vmov 0 }
 0x1ab   : > { %v2841_v61 = vunpack.i.h.bf16 %v2839_v57  ;;  %v2840_v62 = vunpack.i.l.bf16 %v2839_v57  ;;  %v2834_v63 = vpop.permute.xlu0 %2833  ;;  %v2516_v3 = vpack.c.bf16 %v788_v55, %v739_v58  ;;  %vm5211_vm0 = vmpackc.low %vm3942_vm1, %vm4072_vm2  ;;  %v5358_v47 = vsel %vm4108_vm7, 4294967295, %v5357_v47 }
 0x1ac   : > { %v2836_v9 = vunpack.i.h.bf16 %v2834_v63  ;;  %v2835_v10 = vunpack.i.l.bf16 %v2834_v63 }
 0x1ad   : > { %v888_v16 = vsel %vm5210_vm11, %v2840_v62, %v2841_v61  ;;  %2518 = vmatprep.subr.msk.bf16.mxu1 %vm4030_vm13, %v2516_v3 }
 0x1ae   : > { %v839_v17 = vsel %vm5212_vm12, %v2835_v10, %v2836_v9  ;;  %2521 = vmatpush1.bf16.msk.msra.mxu1 %vm4043_vm15, %v2519_v13  ;;  %v4059_v19 = vpop.permute.xlu1 %2848 }
 0x1af   : > { %v2498_v20 = vpack.c.bf16 %v888_v16, %v839_v17  ;;  %v5224_v23 = vunpack.i.l.bf16 %v4059_v19  ;;  %v4066_v24 = vpop.permute.xlu0 %2843  ;;  %v2851_v30 = vunpack.i.h.bf16 %v4059_v19 }
 0x1b0   : > { %v5223_v29 = vunpack.i.l.bf16 %v4066_v24  ;;  %v2846_v35 = vunpack.i.h.bf16 %v4066_v24 }
 0x1b1   : > { %v889_v33 = vsel %vm5210_vm11, %v5224_v23, %v2840_v62  ;;  %2500 = vmatprep.subr.msk.bf16.mxu0 %vm5206_vm3, %v2498_v20  ;;  %vm4103_vm3 = vcmp.le.s32.totalorder %v575_v27, 30  ;;  %v887_v50 = vsel %vm5210_vm11, %v2841_v61, %v2851_v30 }
 0x1b2   : > { %v840_v36 = vsel %vm5212_vm12, %v5223_v29, %v2835_v10  ;;  %v4092_v37 = vpop.permute.xlu1 %2858  ;;  %v5356_v45 = vsel %vm4103_vm3, 4294967295, %v5355_v45  ;;  %v838_v51 = vsel %vm5212_vm12, %v2836_v9, %v2846_v35  ;;  %vm5215_vm4 = vmpackc.low %vm3969_vm6, %vm4103_vm3  ;;  %v5360_v10 = vmov 0 }
 0x1b3   : > { %v2501_v39 = vpack.c.bf16 %v889_v33, %v840_v36  ;;  %v2860_v42 = vunpack.i.l.bf16 %v4092_v37  ;;  %v4099_v43 = vpop.permute.xlu0 %2853  ;;  %v2525_v61 = vpack.c.bf16 %v887_v50, %v838_v51 }
 0x1b4   : > { %v5236_v46 = vunpack.i.l.bf16 %v4099_v43  ;;  %v2856_v28 = vunpack.i.h.bf16 %v4099_v43 }
 0x1b5   : > { %v886_v21 = vsel %vm5210_vm11, %v2851_v30, %v2860_v42  ;;  %2503 = vmatpush1.bf16.msk.msra.mxu0 %vm5211_vm0, %v2501_v39  ;;  %vm5217_vm11 = vcmp.lt.s32.totalorder %v3929_v18, 127  ;;  %vm5214_vm0 = vmpackc.low %vm4007_vm10, %vm4108_vm7  ;;  %v5362_v30 = vmov 0 }
 0x1b6   : > { %v837_v27 = vsel %vm5212_vm12, %v2846_v35, %v5236_v46  ;;  %v4129_v38 = vpop.permute.xlu1 %2868  ;;  %vm5359_vm12 = vmmov 1   ;;  %v5367_v35 = vmov 0 }
 0x1b7   : > { %v2522_v55 = vpack.c.bf16 %v886_v21, %v837_v27  ;;  %v2871_v56 = vunpack.i.h.bf16 %v4129_v38  ;;  %v5222_v57 = vunpack.i.l.bf16 %v4129_v38  ;;  %v2864_v58 = vpop.permute.xlu0 %2863  ;;  %vm4161_vm6 = vmpackc.low %vm4034_vm14, %vm5359_vm12 }
 0x1b8   : > { %v2866_v62 = vunpack.i.h.bf16 %v2864_v58  ;;  %v2865_v63 = vunpack.i.l.bf16 %v2864_v58  ;;  %v5361_v10 = vsel %vm4161_vm6, 4294967295, %v5360_v10  ;;  %vm4194_vm10 = vmpackc.low %vm4108_vm7, %vm5359_vm12 }
 0x1b9   : > { %2524 = vmatprep.subr.msk.bf16.mxu1 %vm5215_vm4, %v2522_v55  ;;  %vm4184_vm4 = vmpackc.low %vm4103_vm3, %vm5359_vm12  ;;  %v5368_v35 = vsel %vm4194_vm10, 4294967295, %v5367_v35 }
 0x1ba   : > { %v936_v3 = vsel %vm5217_vm11, %v2865_v63, %v2866_v62  ;;  %v937_v5 = vsel %vm5217_vm11, %v5222_v57, %v2865_v63  ;;  %2527 = vmatpush1.bf16.msk.msra.mxu1 %vm5214_vm0, %v2525_v61  ;;  %v2874_v9 = vpop.permute.xlu1 %2873  ;;  %v935_v13 = vsel %vm5217_vm11, %v2866_v62, %v2871_v56  ;;  %vm4174_vm0 = vmpackc.low %vm4047_vm5, %vm5359_vm12  ;;  %5369 = vst [vmem:[#allocation33_spill] sm:$0xff] %v5368_v35  ;;  %v2826_v57 = vunpack.i.h.bf16 %v3996_v49 }
 0x1bb   : > { %v2504_v16 = vpack.c.bf16 %v936_v3, %v3850_v4  ;;  %v2507_v17 = vpack.c.bf16 %v937_v5, %v3845_v2  ;;  %v4169_v20 = vpop.permute.xlu0 %922  ;;  %v5363_v30 = vsel %vm4174_vm0, 4294967295, %v5362_v30  ;;  %v5364_v4 = vmov 0 }
 0x1bc   : > { %v934_v33 = vsel %vm5217_vm11, %v2871_v56, %v4169_v20  ;;  %v5365_v4 = vsel %vm4184_vm4, 4294967295, %v5364_v4  ;;  %v2531_v36 = vpack.c.bf16 %v935_v13, %v3839_v0  ;;  %v2876_v39 = vunpack.i.h.bf16 %v2874_v9 }
 0x1bd   : > { %5366 = vst [vmem:[#allocation32_spill] sm:$0xff] %v5365_v4  ;;  %v2528_v2 = vpack.c.bf16 %v934_v33, %v3857_v6  ;;  %2506 = vmatprep.subr.msk.bf16.mxu0 %vm4161_vm6, %v2504_v16  ;;  %v2875_v50 = vunpack.i.l.bf16 %v2874_v9  ;;  %vm5225_vm11 = vcmp.lt.s32.totalorder %v3929_v18, 97  ;;  %vm5226_vm6 = vcmp.lt.s32.totalorder %v3929_v18, 96 }
 0x1be   : > { %2509 = vmatpush1.bf16.msk.msra.mxu0 %vm4174_vm0, %v2507_v17  ;;  %v4201_v51 = vpop.permute.xlu1 %2883  ;;  %v547_v9 = vadd.s32 640, %v3929_v18  ;;  %v5370_v33 = vmov 0  ;;  %vm5379_vm0 = vcmp.lt.s32.totalorder %v3929_v18, 33 }
 0x1bf   : > { %v2879_v6 = vpop.permute.xlu0 %2878  ;;  %2530 = vmatprep.subr.msk.bf16.mxu1 %vm4184_vm4, %v2528_v2  ;;  %v985_v0 = vsel %vm5225_vm11, %v2875_v50, %v2876_v39  ;;  %v5220_v55 = vunpack.i.l.bf16 %v4201_v51  ;;  %v2886_v5 = vunpack.i.h.bf16 %v4201_v51  ;;  %v546_v2 = vadd.s32 512, %v3929_v18  ;;  %vm5381_vm2 = vmmov %vm5379_vm0 }
 0x1c0   : > { %v2881_v21 = vunpack.i.h.bf16 %v2879_v6  ;;  %v2880_v27 = vunpack.i.l.bf16 %v2879_v6  ;;  %2533 = vmatpush1.bf16.msk.msra.mxu1 %vm4194_vm10, %v2531_v36  ;;  %vm4237_vm10 = vmpackc.low %vm5359_vm12, %vm3942_vm1 }
 0x1c1   : > { %v986_v13 = vsel %vm5225_vm11, %v5220_v55, %v2875_v50  ;;  %v5371_v33 = vsel %vm4237_vm10, 4294967295, %v5370_v33  ;;  %v589_v55 = vand.u32 31, %v547_v9 }
 0x1c2   : > { %v1034_v56 = vsel %vm5226_vm6, %v2880_v27, %v2881_v21  ;;  %v4214_v58 = vpop.permute.xlu1 %971  ;;  %5372 = vst [vmem:[#allocation34_spill] sm:$0xff] %v5371_v33 }
 0x1c3   : > { %v2510_v61 = vpack.c.bf16 %v1034_v56, %v985_v0  ;;  %v4216_v62 = vpop.permute.xlu0 %2888  ;;  %v984_v56 = vsel %vm5225_vm11, %v2876_v39, %v2886_v5  ;;  %v5373_v39 = vmov 0 }
 0x1c4   : > { %v2891_v63 = vunpack.i.h.bf16 %v4216_v62  ;;  %v5221_v3 = vunpack.i.l.bf16 %v4216_v62 }
 0x1c5   : > { %2512 = vmatprep.subr.msk.bf16.mxu0 %vm3982_vm8, %v2510_v61  ;;  %vm5408_vm8 = vcmp.lt.s32.totalorder %v3929_v18, 1 }
 0x1c6   : > { %v1035_v16 = vsel %vm5226_vm6, %v5221_v3, %v2880_v27  ;;  %v4232_v17 = vpop.permute.xlu1 %2893  ;;  %v1033_v36 = vsel %vm5226_vm6, %v2881_v21, %v2891_v63  ;;  %v983_v27 = vsel %vm5225_vm11, %v2886_v5, %v4214_v58  ;;  %v2831_v3 = vunpack.i.h.bf16 %v3973_v41 }
 0x1c7   : > { %v2513_v50 = vpack.c.bf16 %v1035_v16, %v986_v13  ;;  %v4244_v6 = vpop.permute.xlu0 %1020  ;;  %v2537_v21 = vpack.c.bf16 %v1033_v36, %v984_v56  ;;  %v582_v16 = vand.u32 31, %v546_v2  ;;  %v4269_v5 = vadd.s32 896, %v3929_v18 }
 0x1c8   : > { %v1032_v0 = vsel %vm5226_vm6, %v2891_v63, %v4244_v6  ;;  %v5232_v63 = vunpack.i.l.bf16 %v4232_v17  ;;  %vm4264_vm6 = vcmp.ge.s32.totalorder %v589_v55, 1  ;;  %v2861_v56 = vunpack.i.h.bf16 %v4092_v37 }
 0x1c9   : > { %v2534_v61 = vpack.c.bf16 %v1032_v0, %v983_v27  ;;  %2515 = vmatpush1.bf16.msk.msra.mxu0 %vm4237_vm10, %v2513_v50  ;;  %v5374_v39 = vsel %vm4264_vm6, 4294967295, %v5373_v39  ;;  %vm5375_vm10 = vcmp.lt.s32.totalorder %v3929_v18, 32  ;;  %vm4275_vm4 = vcmp.ge.s32.totalorder %v582_v16, 1 }
 0x1ca   : > { %v1064_v13 = vpop.permute.xlu1 %1063  ;;  %v548_v50 = vadd.s32 768, %v3929_v18  ;;  %vm5378_vm11 = vmmov %vm5375_vm10  ;;  %v738_v0 = vsel %vm5379_vm0, %v2825_v53, %v2826_v57  ;;  %v737_v41 = vsel %vm5381_vm2, %v2826_v57, %v5232_v63  ;;  %v4306_v53 = vld [vmem:[#allocation5] sm:$0xff]  ;;  %v5385_v57 = vmov 0 }
 0x1cb   : > { %v2899_v29 = vpop.permute.xlu0 %2898  ;;  %2536 = vmatprep.subr.msk.bf16.mxu1 %vm4030_vm13, %v2534_v61  ;;  %v787_v27 = vsel %vm5378_vm11, %v2830_v48, %v2831_v3  ;;  %vm4302_vm0 = vmpackc.low %vm5359_vm12, %vm4264_vm6  ;;  %v2896_v46 = vunpack.i.h.bf16 %v4232_v17  ;;  %vm4333_vm1 = vcmp.le.s32.totalorder %v582_v16, 30  ;;  %v5396_v16 = vmov 0 }
 0x1cc   : > { %v2900_v23 = vunpack.i.l.bf16 %v2899_v29  ;;  %2539 = vmatpush1.bf16.msk.msra.mxu1 %vm4043_vm15, %v2537_v21  ;;  %vm4313_vm2 = vmpackc.low %vm5359_vm12, %vm4275_vm4  ;;  %v2543_v63 = vpack.c.bf16 %v787_v27, %v738_v0  ;;  %v2901_v32 = vunpack.i.h.bf16 %v2899_v29  ;;  %v5391_v29 = vmov 0 }
 0x1cd   : > { %v5386_v57 = vsel %vm4313_vm2, 4294967295, %v5385_v57  ;;  %v5392_v29 = vsel %vm4333_vm1, 4294967295, %v5391_v29  ;;  %v5395_v0 = vmov 0.0   ;;  %vm5399_vm15 = vcmp.lt.s32.totalorder %v3929_v18, 32 }
 0x1ce   : > { %v786_v9 = vsel %vm5375_vm10, %v2831_v3, %v2900_v23  ;;  %v4273_v2 = vpop.permute.xlu1 %1061  ;;  %vm5380_vm10 = vcmp.lt.s32.totalorder %v3929_v18, 95 }
 0x1cf   : > { %v1084_v61 = vsel %vm5380_vm10, %v4273_v2, %v1064_v13  ;;  %v1066_v21 = vpop.permute.xlu0 %1065  ;;  %vm5382_vm11 = vmmov %vm5380_vm10  ;;  %v2540_v3 = vpack.c.bf16 %v786_v9, %v737_v41  ;;  %v596_v41 = vand.u32 31, %v548_v50  ;;  %vm5389_vm10 = vcmp.lt.s32.totalorder %v3929_v18, 1 }
 0x1d0   : > { %v1083_v48 = vsel %vm5382_vm11, %v1064_v13, %v1066_v21  ;;  %v603_v13 = vand.u32 31, %v4269_v5  ;;  %vm4320_vm11 = vcmp.le.s32.totalorder %v589_v55, 30  ;;  %v5393_v55 = vunpack.i.l.bf16 %v4099_v43 }
 0x1d1   : > { %2388 = vmatprep.subr.msk.mxu0 %vm4034_vm14, %v1083_v48  ;;  %v885_v48 = vsel %vm5389_vm10, %v2860_v42, %v2861_v56  ;;  %vm5394_vm14 = vcmp.lt.s32.totalorder %v3929_v18, 31  ;;  %v5398_v43 = vunpack.i.l.bf16 %v3948_v31 }
 0x1d2   : > { %2389 = vmatpush1.msk.msra.mxu0 %vm4047_vm5, %v1084_v61  ;;  %v2909_v14 = vpop.permute.xlu1 %2908  ;;  %vm5390_vm5 = vcmask 588800   ;;  %v836_v37 = vsel %vm5394_vm14, %v5393_v55, %v2856_v28  ;;  %vm4366_vm9 = vcmp.le.s32.totalorder %v603_v13, 30  ;;  %v5404_v55 = vunpack.i.l.bf16 %v3936_v22 }
 0x1d3   : > { %v2910_v33 = vunpack.i.l.bf16 %v2909_v14  ;;  %v2904_v35 = vpop.permute.xlu0 %2903  ;;  %2542 = vmatprep.subr.msk.bf16.mxu0 %vm4302_vm0, %v2540_v3  ;;  %2390 = vmatmul.mubr.msk.f32.vlgmr.msra.gmra.mrb[0].mxu0 %vm5390_vm5, %v4306_v53  ;;  %v2911_v42 = vunpack.i.h.bf16 %v2909_v14  ;;  %vm4346_vm5 = vcmp.ge.s32.totalorder %v603_v13, 1  ;;  %v784_v3 = vsel %vm5399_vm15, %v2901_v32, %v5398_v43 }
 0x1d4   : > { %v2906_v50 = vunpack.i.h.bf16 %v2904_v35  ;;  %v2905_v27 = vunpack.i.l.bf16 %v2904_v35  ;;  %2545 = vmatpush1.bf16.msk.msra.mxu0 %vm4313_vm2, %v2543_v63  ;;  %1327 = vmatprep.mubr.f32.mxu0 %v5395_v0  ;;  %v5397_v16 = vsel %vm4346_vm5, 4294967295, %v5396_v16  ;;  %v5400_v63 = vmov 0  ;;  %vm4396_vm13 = vmpackc.low %vm5359_vm12, %vm4346_vm5 }
 0x1d5   : > { %v884_v61 = vsel %vm5389_vm10, %v2861_v56, %v2910_v33  ;;  %vm4362_vm10 = vcmp.ge.s32.totalorder %v596_v41, 1  ;;  %v5402_v56 = vmov 0  ;;  %v2549_v31 = vpack.c.bf16 %v885_v48, %v836_v37 }
 0x1d6   : > { %v835_v14 = vsel %vm5394_vm14, %v2856_v28, %v2905_v27  ;;  %v4356_v35 = vpop.permute.xlu1 %1069  ;;  %v5401_v63 = vsel %vm4362_vm10, 4294967295, %v5400_v63  ;;  %v5403_v56 = vsel %vm4366_vm9, 4294967295, %v5402_v56  ;;  %vm5405_vm15 = vcmp.lt.s32.totalorder %v3929_v18, 33 }
 0x1d7   : > { %v735_v28 = vsel %vm5405_vm15, %v2896_v46, %v5404_v55  ;;  %vm5406_vm14 = vcmp.lt.s32.totalorder %v3929_v18, 32  ;;  %v2546_v15 = vpack.c.bf16 %v884_v61, %v835_v14  ;;  %v1068_v4 = vpop.permute.xlu0 %1067  ;;  %v5407_v13 = vunpack.i.l.bf16 %v4059_v19 }
 0x1d8   : > { %v785_v43 = vsel %vm5406_vm14, %v2900_v23, %v2901_v32  ;;  %v5409_v22 = vunpack.i.l.bf16 %v4066_v24  ;;  %vm5410_vm2 = vcmp.lt.s32.totalorder %v3929_v18, 31  ;;  %vm5411_vm15 = vcmp.lt.s32.totalorder %v3929_v18, 95 }
 0x1d9   : > { %v882_v48 = vsel %vm5408_vm8, %v2911_v42, %v5407_v13  ;;  %v1081_v32 = vsel %vm5411_vm15, %v1068_v4, %v4356_v35  ;;  %vm5412_vm14 = vmmov %vm5411_vm15  ;;  %v5413_v19 = vmov 0  ;;  %v5415_v61 = vunpack.i.l.bf16 %v4232_v17 }
 0x1da   : > { %v833_v37 = vsel %vm5410_vm2, %v2906_v50, %v5409_v22  ;;  %v1082_v23 = vsel %vm5412_vm14, %v1066_v21, %v1068_v4  ;;  %v5414_v19 = vsel %vm4396_vm13, 4294967295, %v5413_v19  ;;  %vm5416_vm8 = vcmp.lt.s32.totalorder %v3929_v18, 33  ;;  %2401 = vmatprep.subr.msk.mxu1 %vm4103_vm3, %v1081_v32  ;;  %vm5417_vm2 = vmpackc.low %vm4264_vm6, %vm4320_vm11 }
 0x1db   : > { %v736_v24 = vsel %vm5416_vm8, %v5415_v61, %v2896_v46  ;;  %v2564_v14 = vpack.c.bf16 %v784_v3, %v735_v28  ;;  %2548 = vmatprep.subr.msk.bf16.mxu0 %vm5417_vm2, %v2546_v15  ;;  %vm4414_vm15 = vmpackc.low %vm5359_vm12, %vm4362_vm10  ;;  %v5418_v4 = vmov 0  ;;  %vm4418_vm14 = vcmp.le.s32.totalorder %v596_v41, 30  ;;  %2402 = vmatpush1.msk.msra.mxu1 %vm4108_vm7, %v1082_v23  ;;  %v929_v15 = vpop.permute.xlu1 %928  ;;  %v2914_v55 = vpop.permute.xlu0 %2913 }
 0x1dc   : > { %v5419_v4 = vsel %vm4414_vm15, 4294967295, %v5418_v4  ;;  %v5420_v17 = vmov 0  ;;  %v2567_v46 = vpack.c.bf16 %v785_v43, %v736_v24  ;;  %vm5422_vm8 = vmpackc.low %vm4275_vm4, %vm4333_vm1  ;;  %vm5423_vm6 = vcmp.lt.s32.totalorder %v3929_v18, 1 }
 0x1dd   : > { %v5421_v17 = vsel %vm4418_vm14, 4294967295, %v5420_v17  ;;  %2551 = vmatpush1.bf16.msk.msra.mxu0 %vm5422_vm8, %v2549_v31  ;;  %vm5260_vm2 = vmpackc.low %vm4346_vm5, %vm4366_vm9  ;;  %v883_v21 = vsel %vm5423_vm6, %v2910_v33, %v2911_v42  ;;  %vm5424_vm3 = vcmp.lt.s32.totalorder %v3929_v18, 31  ;;  %v2570_v3 = vpack.c.bf16 %v882_v48, %v833_v37  ;;  %2566 = vmatprep.subr.msk.bf16.mxu1 %vm4396_vm13, %v2564_v14 }
 0x1de   : > { %v834_v41 = vsel %vm5424_vm3, %v2905_v27, %v2906_v50  ;;  %vm5425_vm7 = vcmask 588800   ;;  %v5426_v31 = vunpack.i.l.bf16 %v4129_v38  ;;  %vm5427_vm8 = vcmp.lt.s32.totalorder %v3929_v18, 127  ;;  %vm4460_vm6 = vmpackc.low %vm4320_vm11, %vm5359_vm12 }
 0x1df   : > { %2403 = vmatmul.mubr.msk.f32.vlgmr.msra.gmra.mrb[0].mxu1 %vm5425_vm7, %v4306_v53  ;;  %v2916_v43 = vunpack.i.h.bf16 %v2914_v55  ;;  %v2915_v13 = vunpack.i.l.bf16 %v2914_v55  ;;  %v5428_v38 = vmov 0  ;;  %vm5264_vm7 = vcmp.lt.s32.totalorder %v4269_v5, 992  ;;  %vm5430_vm3 = vmmov %vm5427_vm8  ;;  %v2924_v48 = vpop.permute.xlu1 %2923  ;;  %v2919_v24 = vpop.permute.xlu0 %2918 }
 0x1e0   : > { %v938_v28 = vsel %vm5427_vm8, %v929_v15, %v5426_v31  ;;  %2569 = vmatpush1.bf16.msk.msra.mxu1 %vm4414_vm15, %v2567_v46  ;;  %1398 = vmatprep.mubr.f32.mxu1 %v5395_v0  ;;  %v5429_v38 = vsel %vm4460_vm6, 4294967295, %v5428_v38  ;;  %v2573_v33 = vpack.c.bf16 %v883_v21, %v834_v41  ;;  %vm5431_vm13 = vmmov %vm5430_vm3  ;;  %v5432_v22 = vmov 0 }
 0x1e1   : > { %2572 = vmatprep.subr.msk.bf16.mxu1 %vm5260_vm2, %v2570_v3  ;;  %v931_v42 = vsel %vm5427_vm8, %v2916_v43, %v929_v15  ;;  %v932_v50 = vsel %vm5430_vm3, %v2915_v13, %v2916_v43  ;;  %v933_v27 = vsel %vm5431_vm13, %v4169_v20, %v2915_v13  ;;  %vm4475_vm2 = vmpackc.low %vm4366_vm9, %vm5359_vm12  ;;  %v2576_v37 = vpack.c.bf16 %v938_v28, %v3842_v1 }
 0x1e2   : > { %v5433_v22 = vsel %vm4475_vm2, 4294967295, %v5432_v22  ;;  %v2552_v32 = vpack.c.bf16 %v932_v50, %v3886_v11  ;;  %v2555_v23 = vpack.c.bf16 %v933_v27, %v3860_v7  ;;  %v2926_v61 = vunpack.i.h.bf16 %v2924_v48  ;;  %vm4485_vm13 = vmpackc.low %vm4333_vm1, %vm5359_vm12 }
 0x1e3   : > { %5434 = vst [vmem:[#allocation35_spill] sm:$0xff] %v5433_v22  ;;  %v5435_v20 = vmov 0  ;;  %v2925_v14 = vunpack.i.l.bf16 %v2924_v48  ;;  %v2921_v46 = vunpack.i.h.bf16 %v2919_v24  ;;  %v2920_v15 = vunpack.i.l.bf16 %v2919_v24  ;;  %vm5437_vm3 = vmpackc.low %vm4362_vm10, %vm4418_vm14  ;;  %v1027_v55 = vpop.permute.xlu1 %1026 }
 0x1e4   : > { %v5436_v20 = vsel %vm4485_vm13, 4294967295, %v5435_v20  ;;  %2575 = vmatpush1.bf16.msk.msra.mxu1 %vm5437_vm3, %v2573_v33  ;;  %vm4497_vm8 = vmpackc.low %vm4418_vm14, %vm5359_vm12  ;;  %v5438_v1 = vmov 0  ;;  %v2579_v7 = vpack.c.bf16 %v931_v42, %v3889_v12  ;;  %2554 = vmatprep.subr.msk.bf16.mxu0 %vm4460_vm6, %v2552_v32  ;;  %vm5443_vm12 = vcmp.lt.s32.totalorder %v3929_v18, 96  ;;  %v978_v33 = vpop.permute.xlu0 %977 }
 0x1e5   : > { %v5439_v1 = vsel %vm4497_vm8, 4294967295, %v5438_v1  ;;  %2578 = vmatprep.subr.msk.bf16.mxu1 %vm4475_vm2, %v2576_v37  ;;  %vm4510_vm3 = vmand %vm5264_vm7, %vm4346_vm5  ;;  %v1030_v21 = vsel %vm5443_vm12, %v2925_v14, %v2926_v61  ;;  %vm5445_vm6 = vcmp.lt.s32.totalorder %v3929_v18, 97  ;;  %2557 = vmatpush1.bf16.msk.msra.mxu0 %vm4485_vm13, %v2555_v23  ;;  %v5448_v13 = vunpack.i.l.bf16 %v4216_v62 }
 0x1e6   : > { %5440 = vst [vmem:[#allocation36_spill] sm:$0xff] %v5439_v1  ;;  %vm5444_vm10 = vmmov %vm5443_vm12  ;;  %v981_v41 = vsel %vm5445_vm6, %v2920_v15, %v2921_v46  ;;  %v5453_v62 = vmov 0  ;;  %vm5492_vm5 = vcmp.lt.s32.totalorder %v3929_v18, 31 }
 0x1e7   : > { %v1031_v12 = vsel %vm5444_vm10, %v4244_v6, %v2925_v14  ;;  %vm5446_vm2 = vmmov %vm5445_vm6  ;;  %v2558_v31 = vpack.c.bf16 %v1030_v21, %v981_v41 }
 0x1e8   : > { %v982_v3 = vsel %vm5446_vm2, %v4214_v58, %v2920_v15  ;;  %vm5447_vm7 = vmmov %vm5444_vm10  ;;  %v5451_v58 = vunpack.i.l.bf16 %v4201_v51  ;;  %2581 = vmatpush1.bf16.msk.msra.mxu1 %vm4497_vm8, %v2579_v7  ;;  %v1074_v51 = vpop.permute.xlu1 %1073  ;;  %v1072_v37 = vpop.permute.xlu0 %1071  ;;  %vm5481_vm8 = vcmp.lt.s32.totalorder %v3929_v18, 127 }
 0x1e9   : > { %v2561_v28 = vpack.c.bf16 %v1031_v12, %v982_v3  ;;  %v1029_v43 = vsel %vm5447_vm7, %v2926_v61, %v1027_v55  ;;  %vm5449_vm10 = vmmov %vm5447_vm7  ;;  %vm5452_vm7 = vcmp.lt.s32.totalorder %v4269_v5, 992  ;;  %2560 = vmatprep.subr.msk.bf16.mxu0 %vm4302_vm0, %v2558_v31  ;;  %v5460_v61 = vmov 0 }
 0x1ea   : > { %v1036_v6 = vsel %vm5449_vm10, %v1027_v55, %v5448_v13  ;;  %vm5450_vm6 = vmmov %vm5446_vm2  ;;  %v987_v50 = vsel %vm5446_vm2, %v978_v33, %v5451_v58  ;;  %vm5456_vm10 = vnez %v5386_v57 }
 0x1eb   : > { %v980_v42 = vsel %vm5450_vm6, %v2921_v46, %v978_v33  ;;  %vm4544_vm12 = vmpackc.low %vm5452_vm7, %vm4510_vm3  ;;  %v2582_v27 = vpack.c.bf16 %v1036_v6, %v987_v50  ;;  %2563 = vmatpush1.bf16.msk.msra.mxu0 %vm5456_vm10, %v2561_v28  ;;  %vm5457_vm6 = vcmp.lt.s32.totalorder %v3929_v18, 95 }
 0x1ec   : > { %v5454_v62 = vsel %vm4544_vm12, 4294967295, %v5453_v62  ;;  %v2585_v48 = vpack.c.bf16 %v1029_v43, %v980_v42  ;;  %v1079_v32 = vsel %vm5457_vm6, %v1072_v37, %v1074_v51  ;;  %vm5458_vm3 = vmmov %vm5457_vm6  ;;  %v1076_v24 = vpop.permute.xlu0 %1075  ;;  %vm5463_vm6 = vcmask 588800  }
 0x1ed   : > { %5455 = vst [vmem:[#allocation37_spill] sm:$0xff] %v5454_v62  ;;  %2584 = vmatprep.subr.msk.bf16.mxu1 %vm4544_vm12, %v2582_v27  ;;  %v1080_v23 = vsel %vm5458_vm3, %v4356_v35, %v1072_v37  ;;  %2414 = vmatprep.subr.msk.mxu0 %vm4320_vm11, %v1079_v32  ;;  %vm5459_vm2 = vmmov %vm5452_vm7  ;;  %v1078_v35 = vsel %vm5458_vm3, %v1074_v51, %v1076_v24 }
 0x1ee   : > { %2587 = vmatpush1.bf16.msk.msra.mxu1 %vm4414_vm15, %v2585_v48  ;;  %vm4569_vm7 = vmand %vm5459_vm2, %vm4366_vm9  ;;  %vm5486_vm9 = vcmp.lt.s32.totalorder %v3929_v18, 1 }
 0x1ef   : > { %2415 = vmatpush1.msk.msra.mxu0 %vm4333_vm1, %v1080_v23  ;;  %v5461_v61 = vsel %vm4569_vm7, 4294967295, %v5460_v61  ;;  %vm5464_vm12 = vmmov %vm5458_vm3  ;;  %vm5508_vm1 = vcmp.lt.s32.totalorder %v3929_v18, 97 }
 0x1f0   : > { %5462 = vst [vmem:[#allocation38_spill] sm:$0xff] %v5461_v61  ;;  %2416 = vmatmul.mubr.msk.f32.vlgmr.msra.gmra.mrb[2].mxu0 %vm5463_vm6, %v4306_v53  ;;  %v1085_v14 = vsel %vm5464_vm12, %v1076_v24, %v4273_v2  ;;  %vm5465_vm2 = vmmov %vm5463_vm6 }
 0x1f1   : > { %1823 = vmatprep.mubr.f32.mxu0 %v5395_v0  ;;  %2428 = vmatprep.subr.msk.mxu1 %vm4569_vm7, %v1085_v14 }
 0x1f2   : > { %2429 = vmatpush1.msk.msra.mxu1 %vm4418_vm14, %v1078_v35  ;;  %vm5483_vm14 = vnez %v5347_v60 }
 0x1f3   : > { %2430 = vmatmul.mubr.msk.f32.vlgmr.msra.gmra.mrb[2].mxu1 %vm5465_vm2, %v4306_v53 }
 0x1f4   : > { %1894 = vmatprep.mubr.f32.mxu1 %v5395_v0 }
 0x1f7   : > { %v1115_v15 = vpop.permute.xlu1 %1114  ;;  %v5581_v57 = vld [vmem:[#allocation38_spill] sm:$0xff] }
 0x2a6   : > { %v1187_v5 = vpop.f32.mrb[0].mxu0 }
 0x2a7   : > { %v1189_v46 = vpop.f32.mrb[1].mxu0  ;;  %v1188_v7 = vadd.f32 %v1187_v5, %v1115_v15 }
 0x2a8   : > { %v1190_v11 = vadd.f32 %v1189_v46, %v1115_v15 }
 0x2a9   : > { %v1413_v12 = vmul.f32 0.2, %v1188_v7  ;;  %vm1405_vm12 = vcmp.gt.f32.partialorder %v1188_v7, 0.0 }
 0x2aa   : > { %v1414_v41 = vmul.f32 0.2, %v1190_v11  ;;  %vm1406_vm6 = vcmp.gt.f32.partialorder %v1190_v11, 0.0 }
 0x2ab   : > { %v4588_v55 = vsel %vm1405_vm12, %v1188_v7, %v1413_v12 }
 0x2ac   : > { %v4590_v31 = vsel %vm1406_vm6, %v1190_v11, %v1414_v41  ;;  %v1438_v43 = vmul.f32 %v4588_v55, %v4588_v55 }
 0x2ad   : > { %v1439_v13 = vmul.f32 %v4590_v31, %v4590_v31  ;;  %v1429_v42 = vadd.f32 %v4590_v31, %v4588_v55 }
 0x2af   : > { %v1446_v58 = vadd.f32 %v1439_v13, %v1438_v43 }
 0x2b2   : > { %v1258_v21 = vpop.f32.mrb[0].mxu1 }
 0x2b3   : > { %v1260_v2 = vpop.f32.mrb[1].mxu1  ;;  %v1259_v3 = vadd.f32 %v1258_v21, %v1115_v15 }
 0x2b4   : > { %v1261_v53 = vadd.f32 %v1260_v2, %v1115_v15 }
 0x2b5   : > { %v1415_v28 = vmul.f32 0.2, %v1259_v3  ;;  %vm1407_vm3 = vcmp.gt.f32.partialorder %v1259_v3, 0.0 }
 0x2b6   : > { %v1416_v33 = vmul.f32 0.2, %v1261_v53  ;;  %vm1408_vm2 = vcmp.gt.f32.partialorder %v1261_v53, 0.0 }
 0x2b7   : > { %v4596_v6 = vsel %vm1407_vm3, %v1259_v3, %v1415_v28 }
 0x2b8   : > { %v1440_v50 = vmul.f32 %v4596_v6, %v4596_v6  ;;  %v4602_v27 = vsel %vm1408_vm2, %v1261_v53, %v1416_v33  ;;  %v1430_v48 = vadd.f32 %v1429_v42, %v4596_v6 }
 0x2b9   : > { %v1441_v32 = vmul.f32 %v4602_v27, %v4602_v27 }
 0x2ba   : > { %v1447_v37 = vadd.f32 %v1446_v58, %v1440_v50  ;;  %v1431_v5 = vadd.f32 %v1430_v48, %v4602_v27 }
 0x2bc   : > { %v1448_v11 = vadd.f32 %v1447_v37, %v1441_v32 }
 0x2c3   : > { %v1329_v51 = vpop.f32.mrb[2].mxu0 }
 0x2c4   : > { %v1330_v23 = vadd.f32 %v1329_v51, %v1115_v15  ;;  %v1331_v24 = vpop.f32.mrb[3].mxu0 }
 0x2c5   : > { %v1332_v35 = vadd.f32 %v1331_v24, %v1115_v15 }
 0x2c6   : > { %vm1409_vm12 = vcmp.gt.f32.partialorder %v1330_v23, 0.0  ;;  %v1417_v14 = vmul.f32 0.2, %v1330_v23  ;;  %v1400_v7 = vpop.f32.mrb[2].mxu1 }
 0x2c7   : > { %vm1410_vm6 = vcmp.gt.f32.partialorder %v1332_v35, 0.0  ;;  %v1418_v46 = vmul.f32 0.2, %v1332_v35  ;;  %v1401_v2 = vadd.f32 %v1400_v7, %v1115_v15  ;;  %v1402_v12 = vpop.f32.mrb[3].mxu1 }
 0x2c8   : > { %v1425_v21 = vsel %vm1409_vm12, %v1330_v23, %v1417_v14  ;;  %v1403_v53 = vadd.f32 %v1402_v12, %v1115_v15  ;;  %vm5467_vm12 = vcmp.lt.s32.totalorder %v3929_v18, 33 }
 0x2c9   : > { %v1432_v41 = vadd.f32 %v1431_v5, %v1425_v21  ;;  %v1442_v3 = vmul.f32 %v1425_v21, %v1425_v21  ;;  %v4608_v28 = vsel %vm1410_vm6, %v1332_v35, %v1418_v46  ;;  %vm1411_vm3 = vcmp.gt.f32.partialorder %v1401_v2, 0.0 }
 0x2ca   : > { %v1443_v43 = vmul.f32 %v4608_v28, %v4608_v28  ;;  %v1419_v13 = vmul.f32 0.2, %v1401_v2  ;;  %vm1412_vm2 = vcmp.gt.f32.partialorder %v1403_v53, 0.0  ;;  %v1420_v33 = vmul.f32 0.2, %v1403_v53 }
 0x2cb   : > { %v1433_v42 = vadd.f32 %v1432_v41, %v4608_v28  ;;  %v1449_v58 = vadd.f32 %v1448_v11, %v1442_v3  ;;  %v1462_v3 = vld [vmem:[%s451_s13] sm:$0xff]  ;;  %vm5468_vm6 = vcmp.lt.s32.totalorder %v3929_v18, 32  ;;  %s3424_s13 = smov [#allocation17]  }
 0x2cc   : > { %v1427_v50 = vsel %vm1411_vm3, %v1401_v2, %v1419_v13  ;;  %v1428_v48 = vsel %vm1412_vm2, %v1403_v53, %v1420_v33  ;;  %v1464_v13 = vld [vmem:[%s460_s26] sm:$0xff]  ;;  %vm5469_vm3 = vnez %v5339_v44  ;;  %vm5470_vm2 = vmmov %vm5467_vm12  ;;  %s3324_s26 = sshll.u32 %s3424_s13, 4  ;;  %s3325_s26 = int_to_ptr.vmem [resolvable:$false] %s3324_s26 }
 0x2cd   : > { %v1434_v51 = vadd.f32 %v1433_v42, %v1427_v50  ;;  %v1444_v37 = vmul.f32 %v1427_v50, %v1427_v50  ;;  %v1450_v32 = vadd.f32 %v1449_v58, %v1443_v43  ;;  %v1445_v23 = vmul.f32 %v1428_v48, %v1428_v48  ;;  %s3326_s23 = scalar_lea.vmem %s3325_s26, 2048  ;;  %p3327_p3 = scmp.lt.s32.totalorder %s5130_s24, %s3325_s26 }
 0x2ce   : > { %p3328_p12 = scmp.lt.s32.totalorder %s3326_s23, %s3320_s9 }
 0x2cf   : > { %v1435_v24 = vadd.f32 %v1434_v51, %v1428_v48  ;;  %v1451_v35 = vadd.f32 %v1450_v32, %v1444_v37 }
 0x2d0   : > { %p3329_p11 = por %p3328_p12, %p3327_p3 }
 0x2d1   : > { %1436 = vadd.xlane.f32.xlu0 %v1435_v24  ;;  %v1452_v15 = vadd.f32 %v1451_v35, %v1445_v23 }
 0x2d2   : > { %p3330_p13 = pnand %p3329_p11, %p3323_p7 }
 0x2d3   : > { %1453 = vadd.xlane.f32.xlu1 %v1452_v15 }
 0x35e   : > { %v1437_v14 = vpop.xlane.xlu0 %1436 }
 0x35f   : > { %v1455_v5 = vmul.f32 0.0009765625, %v1437_v14 }
 0x360   : > { %v1454_v46 = vpop.xlane.xlu1 %1453 }
 0x361   : > { %v1457_v7 = vmul.f32 %v1455_v5, %v1455_v5  ;;  %v1456_v12 = vmul.f32 0.0009765625, %v1454_v46 }
 0x363   : > { %v1458_v41 = vsub.f32 %v1456_v12, %v1457_v7 }
 0x365   : > { %v1459_v11 = vmax.f32 %v1458_v41, 0.0 }
 0x367   : > { %v1460_v2 = vadd.f32 1e-08, %v1459_v11 }
 0x369   : > { %3054 = vrsqrt.f32 %v1460_v2 }
 0x373   : > { %v3055_v53 = vpop.eup %3054 }
 0x374   : > { %v1463_v43 = vmul.f32 %v3055_v53, %v1462_v3 }
 0x376   : > { %1469 = vperm.xlu0 %2928, %v1463_v43   ;;  %v1465_v33 = vmul.f32 %v1463_v43, %v1455_v5 }
 0x378   : > { %v1466_v42 = vsub.f32 %v1464_v13, %v1465_v33 }
 0x37a   : > { %1482 = vperm.xlu1 %2927, %v1466_v42  }
 0x3f5   : > { %v1470_v58 = vpop.permute.xlu0 %1469 }
 0x3f6   : > { %v1472_v51 = vmul.f32 %v1470_v58, %v4588_v55  ;;  %v1473_v37 = vmul.f32 %v1470_v58, %v4590_v31  ;;  %v1474_v23 = vmul.f32 %v1470_v58, %v4596_v6  ;;  %v1479_v24 = vmul.f32 %v1470_v58, %v1428_v48 }
 0x3f7   : > { %v1475_v7 = vmul.f32 %v1470_v58, %v4602_v27  ;;  %v1476_v55 = vmul.f32 %v1470_v58, %v1425_v21  ;;  %v1477_v41 = vmul.f32 %v1470_v58, %v4608_v28  ;;  %v1478_v11 = vmul.f32 %v1470_v58, %v1427_v50  ;;  %v1750_v28 = vld [vmem:[#allocation13] sm:$0xff] }
 0x3f9   : > { %v1483_v32 = vpop.permute.xlu1 %1482 }
 0x3fa   : > { %v4620_v35 = vadd.f32 %v1483_v32, %v1472_v51  ;;  %v4622_v15 = vadd.f32 %v1483_v32, %v1473_v37  ;;  %v4624_v14 = vadd.f32 %v1483_v32, %v1474_v23  ;;  %v4626_v46 = vadd.f32 %v1483_v32, %v1479_v24 }
 0x3fb   : > { %v4633_v31 = vadd.f32 %v1483_v32, %v1475_v7  ;;  %v4635_v6 = vadd.f32 %v1483_v32, %v1476_v55  ;;  %v4659_v2 = vadd.f32 %v1483_v32, %v1477_v41  ;;  %v4661_v3 = vadd.f32 %v1483_v32, %v1478_v11 }
 0x3fc   : > { %v2959_v5 = vpack.i.bf16 %v4622_v15, %v4620_v35  ;;  %v2969_v48 = vpack.i.bf16 %v4624_v14, %v4626_v46  ;;  %v2989_v27 = vpack.i.bf16 %v4624_v14, %v4622_v15 }
 0x3fd   : > { %v2979_v12 = vpack.i.bf16 %v4635_v6, %v4633_v31  ;;  %v3014_v21 = vpack.i.bf16 %v4633_v31, %v4620_v35  ;;  %5466 = vst [vmem:[#allocation39_spill] sm:$0xff] %v4661_v3  ;;  %v3024_v53 = vpack.i.bf16 %v4661_v3, %v4659_v2 }
 0x3fe   : > { %2960 = vrot.lane.b32.xlu0 %v2959_v5, %s3416_s20  ;;  %2930 = vrot.lane.b32.xlu1 %v2959_v5, %s3413_s15 }
 0x402   : > { %2970 = vrot.lane.b32.xlu0 %v2969_v48, %s3416_s20  ;;  %2935 = vrot.lane.b32.xlu1 %v2959_v5, %s3414_s27 }
 0x406   : > { %2980 = vrot.lane.b32.xlu0 %v2979_v12, %s3416_s20  ;;  %2940 = vrot.lane.b32.xlu1 %v2969_v48, %s3413_s15 }
 0x40a   : > { %2990 = vrot.lane.b32.xlu0 %v2989_v27, %s3417_s28  ;;  %2945 = vrot.lane.b32.xlu1 %v2969_v48, %s3414_s27 }
 0x40e   : > { %1629 = vrot.lane.b32.xlu0 %v4635_v6, %s3417_s28  ;;  %2950 = vrot.lane.b32.xlu1 %v2979_v12, %s3413_s15 }
 0x412   : > { %3005 = vrot.lane.b32.xlu0 %v2989_v27, %s3419_s16  ;;  %2955 = vrot.lane.b32.xlu1 %v2979_v12, %s3414_s27 }
 0x416   : > { %3015 = vrot.lane.b32.xlu0 %v3014_v21, %s3419_s16  ;;  %2965 = vrot.lane.b32.xlu1 %v2959_v5, %s3415_s1 }
 0x41a   : > { %1693 = vrot.lane.b32.xlu0 %v4635_v6, %s3419_s16  ;;  %2975 = vrot.lane.b32.xlu1 %v2969_v48, %s3415_s1 }
 0x41e   : > { %3025 = vrot.lane.b32.xlu0 %v3024_v53, %s3414_s27  ;;  %2985 = vrot.lane.b32.xlu1 %v2979_v12, %s3415_s1 }
 0x422   : > { %1721 = vrot.lane.b32.xlu0 %v4624_v14, %s3421_s18  ;;  %2995 = vrot.lane.b32.xlu1 %v3014_v21, %s3417_s28 }
 0x426   : > { %3030 = vrot.lane.b32.xlu0 %v3024_v53, %s3416_s20  ;;  %3000 = vrot.lane.b32.xlu1 %v2989_v27, %s3418_s14 }
 0x42a   : > { %1723 = vrot.lane.b32.xlu0 %v4633_v31, %s3421_s18  ;;  %3010 = vrot.lane.b32.xlu1 %v3014_v21, %s3418_s14 }
 0x42e   : > { %3040 = vrot.lane.b32.xlu0 %v3024_v53, %s3417_s28  ;;  %1661 = vrot.lane.b32.xlu1 %v4635_v6, %s3418_s14 }
 0x432   : > { %3045 = vrot.lane.b32.xlu0 %v3024_v53, %s3418_s14  ;;  %3020 = vrot.lane.b32.xlu1 %v3024_v53, %s3413_s15 }
 0x436   : > { %1667 = vrot.lane.b32.xlu0 %v4626_v46, %s3418_s14  ;;  %1719 = vrot.lane.b32.xlu1 %v4622_v15, %s3421_s18 }
 0x43a   : > { %1727 = vrot.lane.b32.xlu0 %v4659_v2, %s3421_s18  ;;  %1717 = vrot.lane.b32.xlu1 %v4620_v35, %s3421_s18 }
 0x43e   : > { %1731 = vrot.lane.b32.xlu0 %v4626_v46, %s3421_s18  ;;  %3035 = vrot.lane.b32.xlu1 %v3024_v53, %s3415_s1 }
 0x442   : > { %1725 = vrot.lane.b32.xlu1 %v4635_v6, %s3421_s18 }
 0x446   : > { %1635 = vrot.lane.b32.xlu1 %v4626_v46, %s3417_s28 }
 0x44a   : > { %3050 = vrot.lane.b32.xlu1 %v3024_v53, %s3419_s16 }
 0x44e   : > { %1699 = vrot.lane.b32.xlu1 %v4626_v46, %s3419_s16 }
 0x452   : > { %1729 = vrot.lane.b32.xlu1 %v4661_v3, %s3421_s18 }
 0x456   : > { %1753 = vperm.xlu1 %2927, %v1750_v28  }
 0x470   : > { %v4703_v50 = vpop.permute.xlu0 %2960  ;;  %v2931_v43 = vpop.permute.xlu1 %2930 }
 0x471   : > { %v2933_v13 = vunpack.i.h.bf16 %v2931_v43  ;;  %v2932_v33 = vunpack.i.l.bf16 %v2931_v43 }
 0x473   : > { %v1515_v32 = vsel %vm5467_vm12, %v2932_v33, %v2933_v13  ;;  %vm5471_vm12 = vmmov %vm5468_vm6 }
 0x474   : > { %v4705_v42 = vpop.permute.xlu0 %2970  ;;  %v2936_v58 = vpop.permute.xlu1 %2935 }
 0x475   : > { %v2938_v51 = vunpack.i.h.bf16 %v2936_v58  ;;  %v2937_v37 = vunpack.i.l.bf16 %v2936_v58 }
 0x477   : > { %v1547_v23 = vsel %vm5468_vm6, %v2937_v37, %v2938_v51  ;;  %vm5472_vm6 = vnez %v5341_v52 }
 0x478   : > { %v2588_v24 = vpack.c.bf16 %v1547_v23, %v1515_v32  ;;  %v4711_v5 = vpop.permute.xlu0 %2980  ;;  %v4713_v7 = vpop.permute.xlu1 %2940 }
 0x479   : > { %v5267_v55 = vunpack.i.l.bf16 %v4713_v7  ;;  %v2943_v32 = vunpack.i.h.bf16 %v4713_v7 }
 0x47a   : > { %2590 = vmatprep.subr.msk.bf16.mxu0 %vm5469_vm3, %v2588_v24 }
 0x47b   : > { %v1516_v21 = vsel %vm5470_vm2, %v5267_v55, %v2932_v33  ;;  %vm5473_vm2 = vmmov %vm5471_vm12 }
 0x47c   : > { %v4718_v48 = vpop.permute.xlu0 %2990  ;;  %v4720_v12 = vpop.permute.xlu1 %2945 }
 0x47d   : > { %v5268_v27 = vunpack.i.l.bf16 %v4720_v12  ;;  %v2948_v43 = vunpack.i.h.bf16 %v4720_v12  ;;  %v2993_v3 = vunpack.i.h.bf16 %v4718_v48  ;;  %v2992_v22 = vunpack.i.l.bf16 %v4718_v48 }
 0x47f   : > { %v1548_v41 = vsel %vm5471_vm12, %v5268_v27, %v2937_v37  ;;  %v1546_v24 = vsel %vm5473_vm2, %v2938_v51, %v2948_v43  ;;  %vm5474_vm12 = vcmp.lt.s32.totalorder %v3929_v18, 33 }
 0x480   : > { %v2591_v11 = vpack.c.bf16 %v1548_v41, %v1516_v21  ;;  %v4731_v53 = vpop.permute.xlu0 %1629  ;;  %v4733_v28 = vpop.permute.xlu1 %2950  ;;  %v2963_v21 = vunpack.i.h.bf16 %v4703_v50  ;;  %v2962_v41 = vunpack.i.l.bf16 %v4703_v50  ;;  %vm5476_vm7 = vmmov %vm5474_vm12 }
 0x481   : > { %v5274_v58 = vunpack.i.l.bf16 %v4733_v28  ;;  %v1514_v55 = vsel %vm5476_vm7, %v2933_v13, %v2943_v32  ;;  %vm5479_vm7 = vcmp.lt.s32.totalorder %v3929_v18, 1 }
 0x482   : > { %2593 = vmatpush1.bf16.msk.msra.mxu0 %vm5472_vm6, %v2591_v11  ;;  %vm5475_vm6 = vmmov %vm5473_vm2  ;;  %v2615_v62 = vpack.c.bf16 %v1546_v24, %v1514_v55  ;;  %vm5477_vm2 = vnez %v5345_v59 }
 0x483   : > { %v1513_v52 = vsel %vm5474_vm12, %v2943_v32, %v5274_v58  ;;  %vm5478_vm12 = vcmp.lt.s32.totalorder %v3929_v18, 31  ;;  %v5284_v58 = vunpack.i.l.bf16 %v4705_v42 }
 0x484   : > { %v4740_v33 = vpop.permute.xlu0 %3005  ;;  %v4742_v23 = vpop.permute.xlu1 %2955 }
 0x485   : > { %v5280_v37 = vunpack.i.l.bf16 %v4742_v23 }
 0x487   : > { %v1545_v11 = vsel %vm5475_vm6, %v2948_v43, %v5280_v37  ;;  %v1579_v43 = vsel %vm5478_vm12, %v2962_v41, %v2963_v21  ;;  %vm5480_vm6 = vnez %v5349_v8  ;;  %vm5482_vm12 = vnez %v5333_v34 }
 0x488   : > { %v2612_v27 = vpack.c.bf16 %v1545_v11, %v1513_v52  ;;  %v4759_v61 = vpop.permute.xlu0 %3015  ;;  %v2966_v51 = vpop.permute.xlu1 %2965  ;;  %vm5484_vm13 = vmpackc.low %vm5482_vm12, %vm5483_vm14  ;;  %v5520_v8 = vunpack.i.l.bf16 %v4742_v23 }
 0x489   : > { %v2968_v1 = vunpack.i.h.bf16 %v2966_v51  ;;  %v2967_v50 = vunpack.i.l.bf16 %v2966_v51  ;;  %v2982_v51 = vunpack.i.l.bf16 %v4711_v5 }
 0x48a   : > { %2614 = vmatprep.subr.msk.bf16.mxu1 %vm5477_vm2, %v2612_v27  ;;  %v1642_v27 = vsel %vm5481_vm8, %v2992_v22, %v2993_v3  ;;  %vm5488_vm8 = vnez %v5354_v25 }
 0x48b   : > { %v1611_v13 = vsel %vm5479_vm7, %v2967_v50, %v2968_v1  ;;  %2617 = vmatpush1.bf16.msk.msra.mxu1 %vm5480_vm6, %v2615_v62  ;;  %vm5485_vm7 = vcmp.lt.s32.totalorder %v3929_v18, 31 }
 0x48c   : > { %v2594_v55 = vpack.c.bf16 %v1611_v13, %v1579_v43  ;;  %v4772_v32 = vpop.permute.xlu1 %2975  ;;  %v4774_v24 = vpop.permute.xlu0 %1693  ;;  %v1580_v62 = vsel %vm5485_vm7, %v5284_v58, %v2962_v41  ;;  %v2973_v13 = vunpack.i.h.bf16 %v4705_v42  ;;  %vm5490_vm7 = vmmov %vm5486_vm9 }
 0x48d   : > { %v2977_v48 = vunpack.i.l.bf16 %v4772_v32  ;;  %v2978_v52 = vunpack.i.h.bf16 %v4772_v32  ;;  %vm5493_vm15 = vmmov %vm5490_vm7 }
 0x48e   : > { %2596 = vmatprep.subr.msk.bf16.mxu0 %vm5484_vm13, %v2594_v55  ;;  %v2600_v55 = vpack.c.bf16 %v1642_v27, %v4622_v15  ;;  %vm5487_vm13 = vnez %v5331_v26  ;;  %v1577_v15 = vsel %vm5492_vm5, %v2973_v13, %v2982_v51 }
 0x48f   : > { %v1612_v11 = vsel %vm5486_vm9, %v2977_v48, %v2967_v50  ;;  %vm5489_vm12 = vmpackc.low %vm5487_vm13, %vm5488_vm8  ;;  %v1610_v41 = vsel %vm5490_vm7, %v2968_v1, %v2978_v52  ;;  %vm5491_vm9 = vnez %v5361_v10  ;;  %vm5499_vm7 = vnez %v5356_v45 }
 0x490   : > { %v2597_v43 = vpack.c.bf16 %v1612_v11, %v1580_v62  ;;  %v4794_v34 = vpop.permute.xlu1 %2985  ;;  %v4806_v50 = vpop.permute.xlu0 %3025  ;;  %vm5494_vm13 = vmmov %vm5492_vm5  ;;  %v3008_v11 = vunpack.i.h.bf16 %v4740_v33  ;;  %vm5495_vm5 = vcmp.lt.s32.totalorder %v3929_v18, 127  ;;  %v5545_v45 = vunpack.i.l.bf16 %v4705_v42 }
 0x491   : > { %v2987_v37 = vunpack.i.l.bf16 %v4794_v34  ;;  %v1578_v1 = vsel %vm5494_vm13, %v2963_v21, %v2973_v13  ;;  %vm5497_vm8 = vmmov %vm5495_vm5  ;;  %vm5501_vm13 = vnez %v5343_v54  ;;  %v5287_v54 = vunpack.i.l.bf16 %v4759_v61 }
 0x492   : > { %2599 = vmatpush1.bf16.msk.msra.mxu0 %vm5489_vm12, %v2597_v43  ;;  %v2621_v43 = vpack.c.bf16 %v1610_v41, %v1578_v1  ;;  %vm5498_vm12 = vnez %v5337_v40 }
 0x493   : > { %2602 = vmatprep.subr.msk.bf16.mxu0 %vm5491_vm9, %v2600_v55  ;;  %v1609_v26 = vsel %vm5493_vm15, %v2978_v52, %v2987_v37  ;;  %v3007_v55 = vunpack.i.l.bf16 %v4740_v33  ;;  %vm5496_vm15 = vmmov %vm5495_vm5 }
 0x494   : > { %v4818_v25 = vpop.permute.xlu1 %2995  ;;  %v2618_v27 = vpack.c.bf16 %v1609_v26, %v1577_v15  ;;  %vm5500_vm9 = vmpackc.low %vm5498_vm12, %vm5499_vm7  ;;  %v5505_v26 = vld [vmem:[#allocation32_spill] sm:$0xff] }
 0x495   : > { %v2998_v62 = vunpack.i.h.bf16 %v4818_v25  ;;  %v2997_v10 = vunpack.i.l.bf16 %v4818_v25  ;;  %vm5506_vm12 = vnez %v5505_v26 }
 0x496   : > { %2620 = vmatprep.subr.msk.bf16.mxu1 %vm5500_vm9, %v2618_v27  ;;  %vm5507_vm9 = vcmp.lt.s32.totalorder %v3929_v18, 96 }
 0x497   : > { %v1640_v58 = vsel %vm5495_vm5, %v2998_v62, %v4731_v53  ;;  %v1641_v52 = vsel %vm5496_vm15, %v2993_v3, %v2998_v62  ;;  %v1643_v21 = vsel %vm5497_vm8, %v2997_v10, %v2992_v22  ;;  %vm5502_vm5 = vnez %v5358_v47  ;;  %v4848_v22 = vpop.permute.xlu0 %1721 }
 0x498   : > { %v2624_v33 = vpack.c.bf16 %v1640_v58, %v4633_v31  ;;  %v2627_v13 = vpack.c.bf16 %v1641_v52, %v4624_v14  ;;  %v2603_v41 = vpack.c.bf16 %v1643_v21, %v4620_v35  ;;  %vm5503_vm15 = vmpackc.low %vm5501_vm13, %vm5502_vm5  ;;  %v3001_v3 = vpop.permute.xlu1 %3000  ;;  %vm5504_vm8 = vnez %v5363_v30  ;;  %v5509_v58 = vld [vmem:[#allocation33_spill] sm:$0xff] }
 0x499   : > { %2623 = vmatpush1.bf16.msk.msra.mxu1 %vm5503_vm15, %v2621_v43  ;;  %v3003_v40 = vunpack.i.h.bf16 %v3001_v3  ;;  %v3002_v15 = vunpack.i.l.bf16 %v3001_v3  ;;  %v1706_v35 = vsel %vm5507_vm9, %v3007_v55, %v3008_v11  ;;  %vm5510_vm13 = vnez %v5509_v58  ;;  %vm5511_vm15 = vmmov %vm5507_vm9 }
 0x49a   : > { %2605 = vmatpush1.bf16.msk.msra.mxu0 %vm5504_vm8, %v2603_v41  ;;  %2626 = vmatprep.subr.msk.bf16.mxu1 %vm5506_vm12, %v2624_v33  ;;  %v3018_v62 = vunpack.i.h.bf16 %v4759_v61  ;;  %v1707_v43 = vsel %vm5511_vm15, %v5287_v54, %v3007_v55  ;;  %vm5512_vm8 = vmmov %vm5508_vm1  ;;  %v2958_v58 = vunpack.i.h.bf16 %v4742_v23  ;;  %vm5518_vm15 = vcmp.lt.s32.totalorder %v3929_v18, 95 }
 0x49b   : > { %v1674_v14 = vsel %vm5508_vm1, %v3002_v15, %v3003_v40  ;;  %v4872_v52 = vpop.permute.xlu0 %3030  ;;  %vm5514_vm12 = vmmov %vm5508_vm1 }
 0x49c   : > { %v2606_v31 = vpack.c.bf16 %v1706_v35, %v1674_v14  ;;  %v4861_v1 = vpop.permute.xlu1 %3010  ;;  %v5516_v35 = vld [vmem:[#allocation34_spill] sm:$0xff] }
 0x49d   : > { %2629 = vmatpush1.bf16.msk.msra.mxu1 %vm5510_vm13, %v2627_v13  ;;  %v3013_v30 = vunpack.i.h.bf16 %v4861_v1  ;;  %v3012_v27 = vunpack.i.l.bf16 %v4861_v1  ;;  %vm5517_vm13 = vnez %v5516_v35 }
 0x49e   : > { %2608 = vmatprep.subr.msk.bf16.mxu0 %vm5469_vm3, %v2606_v31  ;;  %vm5513_vm3 = vmmov %vm5507_vm9 }
 0x49f   : > { %v1675_v21 = vsel %vm5508_vm1, %v3012_v27, %v3002_v15  ;;  %v1673_v33 = vsel %vm5512_vm8, %v3003_v40, %v3013_v30  ;;  %v1704_v44 = vsel %vm5513_vm3, %v3018_v62, %v4774_v24  ;;  %vm5515_vm9 = vmmov %vm5513_vm3  ;;  %v1724_v14 = vpop.permute.xlu0 %1723  ;;  %vm5519_vm1 = vcmp.lt.s32.totalorder %v3929_v18, 33 }
 0x4a0   : > { %v2609_v13 = vpack.c.bf16 %v1707_v43, %v1675_v21  ;;  %v4880_v41 = vpop.permute.xlu1 %1661  ;;  %v1705_v3 = vsel %vm5515_vm9, %v3008_v11, %v3018_v62  ;;  %v3027_v11 = vunpack.i.l.bf16 %v4806_v50  ;;  %vm5524_vm8 = vmmov %vm5519_vm1  ;;  %vm5529_vm9 = vcmp.lt.s32.totalorder %v3929_v18, 1 }
 0x4a1   : > { %v1672_v55 = vsel %vm5514_vm12, %v3013_v30, %v4880_v41  ;;  %v2633_v15 = vpack.c.bf16 %v1705_v3, %v1673_v33  ;;  %v2953_v30 = vunpack.i.h.bf16 %v4733_v28  ;;  %v5523_v3 = vunpack.i.l.bf16 %v4733_v28 }
 0x4a2   : > { %v2630_v26 = vpack.c.bf16 %v1704_v44, %v1672_v55  ;;  %2611 = vmatpush1.bf16.msk.msra.mxu0 %vm5517_vm13, %v2609_v13  ;;  %v4916_v55 = vld [vmem:[#allocation11] sm:$0xff]  ;;  %vm5528_vm12 = vcmask 588800   ;;  %vm5530_vm13 = vcmp.lt.s32.totalorder %v3929_v18, 31 }
 0x4a3   : > { %v4910_v33 = vpop.permute.xlu0 %3040  ;;  %v1512_v60 = vsel %vm5524_vm8, %v5523_v3, %v2953_v30 }
 0x4a4   : > { %v3021_v40 = vpop.permute.xlu1 %3020  ;;  %2632 = vmatprep.subr.msk.bf16.mxu1 %vm5477_vm2, %v2630_v26  ;;  %vm5521_vm2 = vcmp.lt.s32.totalorder %v3929_v18, 32  ;;  %v3043_v28 = vunpack.i.h.bf16 %v4910_v33  ;;  %v3042_v54 = vunpack.i.l.bf16 %v4910_v33 }
 0x4a5   : > { %2635 = vmatpush1.bf16.msk.msra.mxu1 %vm5480_vm6, %v2633_v15  ;;  %v3022_v31 = vunpack.i.l.bf16 %v3021_v40  ;;  %v1544_v21 = vsel %vm5521_vm2, %v5520_v8, %v2958_v58  ;;  %vm5522_vm6 = vmmov %vm5521_vm2  ;;  %v2988_v15 = vunpack.i.h.bf16 %v4794_v34  ;;  %v3032_v8 = vunpack.i.l.bf16 %v4872_v52 }
 0x4a6   : > { %v1543_v13 = vsel %vm5522_vm6, %v2958_v58, %v3027_v11  ;;  %v2639_v35 = vpack.c.bf16 %v1544_v21, %v1512_v60  ;;  %v2983_v58 = vunpack.i.h.bf16 %v4711_v5  ;;  %vm5533_vm2 = vmmov %vm5529_vm9  ;;  %v5534_v34 = vunpack.i.l.bf16 %v4720_v12 }
 0x4a7   : > { %v1511_v59 = vsel %vm5519_vm1, %v2953_v30, %v3022_v31  ;;  %v3028_v30 = vunpack.i.h.bf16 %v4806_v50  ;;  %v4940_v21 = vpop.permute.xlu0 %3045  ;;  %v1608_v33 = vsel %vm5529_vm9, %v2987_v37, %v2988_v15  ;;  %vm5532_vm1 = vcmp.lt.s32.totalorder %v3929_v18, 127 }
 0x4a8   : > { %v1720_v62 = vpop.permute.xlu1 %1719  ;;  %v2636_v26 = vpack.c.bf16 %v1543_v13, %v1511_v59  ;;  %v1576_v50 = vsel %vm5530_vm13, %v2982_v51, %v2983_v58  ;;  %v1638_v60 = vsel %vm5532_vm1, %v3042_v54, %v3043_v28  ;;  %v5535_v5 = vunpack.i.l.bf16 %v4713_v7  ;;  %vm5538_vm9 = vmmov %vm5532_vm1 }
 0x4a9   : > { %v1738_v43 = vsel %vm5518_vm15, %v1720_v62, %v4848_v22  ;;  %v1541_v37 = vsel %vm5522_vm6, %v3028_v30, %v5534_v34  ;;  %v1639_v7 = vsel %vm5538_vm9, %v4731_v53, %v3042_v54  ;;  %v5574_v34 = vld [vmem:[#allocation36_spill] sm:$0xff] }
 0x4aa   : > { %2442 = vmatprep.subr.msk.mxu0 %vm5483_vm14, %v1738_v43  ;;  %vm5525_vm14 = vmmov %vm5518_vm15  ;;  %v5526_v43 = vld [vmem:[#allocation31_spill] sm:$0xff]  ;;  %v2651_v47 = vpack.c.bf16 %v1639_v7, %v4635_v6  ;;  %v3048_v6 = vunpack.i.h.bf16 %v4940_v21 }
 0x4ab   : > { %vm5527_vm3 = vnez %v5526_v43  ;;  %vm5531_vm15 = vmmov %vm5530_vm13  ;;  %v1668_v54 = vpop.permute.xlu0 %1667 }
 0x4ac   : > { %v4914_v44 = vpop.permute.xlu1 %1717  ;;  %vm5539_vm13 = vmmov %vm5533_vm2 }
 0x4ad   : > { %v1739_v23 = vsel %vm5525_vm14, %v4914_v44, %v1720_v62  ;;  %v3023_v62 = vunpack.i.h.bf16 %v3021_v40  ;;  %v1575_v40 = vsel %vm5531_vm15, %v2983_v58, %v3032_v8  ;;  %v2645_v58 = vpack.c.bf16 %v1608_v33, %v1576_v50 }
 0x4ae   : > { %2443 = vmatpush1.msk.msra.mxu0 %vm5527_vm3, %v1739_v23  ;;  %v3033_v23 = vunpack.i.h.bf16 %v4872_v52  ;;  %vm5536_vm3 = vmmov %vm5524_vm8  ;;  %vm5540_vm15 = vnez %v5374_v39 }
 0x4af   : > { %2444 = vmatmul.mubr.msk.f32.vlgmr.msra.gmra.mrb[4].mxu0 %vm5528_vm12, %v4916_v55  ;;  %2638 = vmatprep.subr.msk.bf16.mxu0 %vm4302_vm0, %v2636_v26  ;;  %v1509_v51 = vsel %vm5524_vm8, %v3023_v62, %v5535_v5  ;;  %v1510_v12 = vsel %vm5536_vm3, %v3022_v31, %v3023_v62  ;;  %vm5537_vm12 = vmmov %vm5525_vm14  ;;  %vm5548_vm3 = vnez %v5429_v38  ;;  %v1728_v25 = vpop.permute.xlu0 %1727 }
 0x4b0   : > { %v3036_v59 = vpop.permute.xlu1 %3035  ;;  %2641 = vmatpush1.bf16.msk.msra.mxu0 %vm5456_vm10, %v2639_v35  ;;  %1965 = vmatprep.mubr.f32.mxu0 %v5395_v0  ;;  %vm5541_vm1 = vmpackc.low %vm5540_vm15, %vm4320_vm11  ;;  %v2660_v53 = vpack.c.bf16 %v1541_v37, %v1509_v51  ;;  %vm5554_vm15 = vnez %v5397_v16  ;;  %v5576_v37 = vld [vmem:[#allocation37_spill] sm:$0xff] }
 0x4b1   : > { %v3037_v13 = vunpack.i.l.bf16 %v3036_v59  ;;  %v3038_v3 = vunpack.i.h.bf16 %v3036_v59  ;;  %v2648_v59 = vpack.c.bf16 %v1638_v60, %v4659_v2 }
 0x4b3   : > { %v1607_v26 = vsel %vm5533_vm2, %v2988_v15, %v3037_v13  ;;  %v1737_v15 = vsel %vm5525_vm14, %v4848_v22, %v1724_v14  ;;  %v1605_v33 = vsel %vm5539_vm13, %v3038_v3, %v2977_v48  ;;  %vm5542_vm2 = vmmov %vm5522_vm6  ;;  %vm5543_vm6 = vnez %v5392_v29  ;;  %v1732_v1 = vpop.permute.xlu0 %1731 }
 0x4b4   : > { %v2642_v35 = vpack.c.bf16 %v1607_v26, %v1575_v40  ;;  %v4965_v43 = vpop.permute.xlu1 %1725  ;;  %v1542_v22 = vsel %vm5542_vm2, %v3027_v11, %v3028_v30  ;;  %vm5544_vm8 = vmpackc.low %vm4275_vm4, %vm5543_vm6  ;;  %vm5547_vm14 = vcmask 588800   ;;  %vm5550_vm4 = vnez %v5414_v19 }
 0x4b5   : > { %v1736_v52 = vsel %vm5537_vm12, %v1724_v14, %v4965_v43  ;;  %v2663_v2 = vpack.c.bf16 %v1542_v22, %v1510_v12  ;;  %vm5551_vm12 = vmmov %vm5538_vm9  ;;  %vm5552_vm9 = vnez %v5419_v4  ;;  %v3047_v14 = vunpack.i.l.bf16 %v4940_v21 }
 0x4b6   : > { %2455 = vmatprep.subr.msk.mxu1 %vm5499_vm7, %v1736_v52  ;;  %2644 = vmatprep.subr.msk.bf16.mxu0 %vm5541_vm1, %v2642_v35  ;;  %vm5546_vm7 = vcmp.lt.s32.totalorder %v3929_v18, 31  ;;  %vm5555_vm1 = vnez %v5403_v56 }
 0x4b7   : > { %2456 = vmatpush1.msk.msra.mxu1 %vm5502_vm5, %v1737_v15  ;;  %2647 = vmatpush1.bf16.msk.msra.mxu0 %vm5544_vm8, %v2645_v58  ;;  %v1573_v39 = vsel %vm5546_vm7, %v3033_v23, %v5545_v45  ;;  %vm5549_vm5 = vmmov %vm5539_vm13  ;;  %vm5557_vm8 = vnez %v5436_v20 }
 0x4b8   : > { %v1636_v32 = vpop.permute.xlu1 %1635  ;;  %2457 = vmatmul.mubr.msk.f32.vlgmr.msra.gmra.mrb[4].mxu1 %vm5547_vm14, %v4916_v55  ;;  %2650 = vmatprep.subr.msk.bf16.mxu0 %vm5548_vm3, %v2648_v59  ;;  %v1606_v36 = vsel %vm5549_vm5, %v3037_v13, %v3038_v3  ;;  %v2666_v48 = vpack.c.bf16 %v1605_v33, %v1573_v39  ;;  %vm5553_vm13 = vmmov %vm5546_vm7  ;;  %vm5559_vm14 = vnez %v5401_v63  ;;  %vm5560_vm3 = vnez %v5421_v17  ;;  %v5568_v63 = vld [vmem:[#allocation39_spill] sm:$0xff] }
 0x4b9   : > { %2662 = vmatprep.subr.msk.bf16.mxu1 %vm5550_vm4, %v2660_v53  ;;  %2036 = vmatprep.mubr.f32.mxu1 %v5395_v0  ;;  %v1644_v42 = vsel %vm5551_vm12, %v1636_v32, %v2997_v10  ;;  %v1574_v38 = vsel %vm5553_vm13, %v3032_v8, %v3033_v23  ;;  %vm5556_vm2 = vmpackc.low %vm5554_vm15, %vm5555_vm1  ;;  %vm5562_vm4 = vcmp.lt.s32.totalorder %v3929_v18, 97  ;;  %vm5564_vm13 = vcmp.lt.s32.totalorder %v3929_v18, 96 }
 0x4ba   : > { %2665 = vmatpush1.bf16.msk.msra.mxu1 %vm5552_vm9, %v2663_v2  ;;  %v2669_v0 = vpack.c.bf16 %v1606_v36, %v1574_v38  ;;  %vm5558_vm7 = vmmov %vm5551_vm12  ;;  %v2672_v31 = vpack.c.bf16 %v1644_v42, %v4626_v46  ;;  %v1670_v16 = vsel %vm5562_vm4, %v3047_v14, %v3048_v6 }
 0x4bb   : > { %2668 = vmatprep.subr.msk.bf16.mxu1 %vm5556_vm2, %v2666_v48  ;;  %2653 = vmatpush1.bf16.msk.msra.mxu0 %vm5557_vm8, %v2651_v47  ;;  %v1637_v10 = vsel %vm5558_vm7, %v3043_v28, %v1636_v32  ;;  %vm5561_vm5 = vmpackc.low %vm5559_vm14, %vm5560_vm3  ;;  %v5566_v28 = vld [vmem:[#allocation35_spill] sm:$0xff] }
 0x4bc   : > { %v3051_v19 = vpop.permute.xlu1 %3050  ;;  %vm5563_vm12 = vmmov %vm5562_vm4  ;;  %vm5567_vm1 = vnez %v5566_v28  ;;  %v2675_v30 = vpack.c.bf16 %v1637_v10, %v5568_v63 }
 0x4bd   : > { %v3053_v11 = vunpack.i.h.bf16 %v3051_v19  ;;  %v3052_v8 = vunpack.i.l.bf16 %v3051_v19  ;;  %v1671_v56 = vsel %vm5563_vm12, %v4880_v41, %v3047_v14  ;;  %vm5565_vm15 = vmmov %vm5564_vm13  ;;  %vm5578_vm12 = vcmp.lt.s32.totalorder %v3929_v18, 95 }
 0x4be   : > { %2671 = vmatpush1.bf16.msk.msra.mxu1 %vm5561_vm5, %v2669_v0  ;;  %vm5569_vm2 = vmmov %vm5562_vm4  ;;  %vm5575_vm5 = vnez %v5574_v34  ;;  %vm5577_vm4 = vnez %v5576_v37 }
 0x4bf   : > { %v1702_v20 = vsel %vm5564_vm13, %v3052_v8, %v3053_v11  ;;  %v1703_v46 = vsel %vm5565_vm15, %v4774_v24, %v3052_v8  ;;  %2674 = vmatprep.subr.msk.bf16.mxu1 %vm5567_vm1, %v2672_v31  ;;  %v1669_v3 = vsel %vm5569_vm2, %v3048_v6, %v1668_v54  ;;  %vm5570_vm8 = vmmov %vm5569_vm2  ;;  %v5572_v24 = vunpack.i.l.bf16 %v4759_v61 }
 0x4c0   : > { %v2654_v62 = vpack.c.bf16 %v1702_v20, %v1670_v16  ;;  %v2657_v21 = vpack.c.bf16 %v1703_v46, %v1671_v56  ;;  %v1700_v13 = vpop.permute.xlu1 %1699  ;;  %v1676_v41 = vsel %vm5570_vm8, %v1668_v54, %v3012_v27  ;;  %vm5571_vm7 = vmmov %vm5564_vm13 }
 0x4c1   : > { %v1701_v50 = vsel %vm5571_vm7, %v3053_v11, %v1700_v13  ;;  %vm5573_vm14 = vmmov %vm5571_vm7 }
 0x4c2   : > { %v1708_v40 = vsel %vm5573_vm14, %v1700_v13, %v5572_v24  ;;  %v2681_v26 = vpack.c.bf16 %v1701_v50, %v1669_v3  ;;  %2677 = vmatpush1.bf16.msk.msra.mxu1 %vm5575_vm5, %v2675_v30  ;;  %2656 = vmatprep.subr.msk.bf16.mxu0 %vm4302_vm0, %v2654_v62  ;;  %vm5579_vm13 = vmmov %vm5578_vm12  ;;  %vm5582_vm0 = vnez %v5581_v57 }
 0x4c3   : > { %v2678_v60 = vpack.c.bf16 %v1708_v40, %v1676_v41  ;;  %2659 = vmatpush1.bf16.msk.msra.mxu0 %vm5456_vm10, %v2657_v21  ;;  %v1740_v23 = vsel %vm5579_vm13, %v1732_v1, %v4914_v44  ;;  %vm5580_vm15 = vmmov %vm5578_vm12  ;;  %vm5583_vm10 = vcmask 588800  }
 0x4c4   : > { %v1730_v27 = vpop.permute.xlu1 %1729  ;;  %v1735_v49 = vsel %vm5580_vm15, %v4965_v43, %v1728_v25  ;;  %vm5584_vm1 = vmmov %vm5578_vm12 }
 0x4c5   : > { %2680 = vmatprep.subr.msk.bf16.mxu1 %vm5577_vm4, %v2678_v60  ;;  %v1734_v61 = vsel %vm5578_vm12, %v1728_v25, %v1730_v27  ;;  %v1733_v44 = vsel %vm5584_vm1, %v1730_v27, %v1732_v1 }
 0x4c6   : > { %2683 = vmatpush1.bf16.msk.msra.mxu1 %vm5552_vm9, %v2681_v26  ;;  %2468 = vmatprep.subr.msk.mxu0 %vm4320_vm11, %v1734_v61  ;;  %vm5585_vm9 = vmmov %vm5583_vm10 }
 0x4c7   : > { %2482 = vmatprep.subr.msk.mxu1 %vm5582_vm0, %v1740_v23  ;;  %2469 = vmatpush1.msk.msra.mxu0 %vm5543_vm6, %v1735_v49 }
 0x4c8   : > { %2470 = vmatmul.mubr.msk.f32.vlgmr.msra.gmra.mrb[6].mxu0 %vm5583_vm10, %v4916_v55 }
 0x4ca   : > { %2483 = vmatpush1.msk.msra.mxu1 %vm5560_vm3, %v1733_v44  ;;  %v2100_v44 = vld [vmem:[%s477_s22] sm:$0xff] }
 0x4cb   : > { %2484 = vmatmul.mubr.msk.f32.vlgmr.msra.gmra.mrb[6].mxu1 %vm5585_vm9, %v4916_v55 }
 0x4d5   : > { %v1754_v5 = vpop.permute.xlu1 %1753 }
 0x582   : > { %v1825_v9 = vpop.f32.mrb[4].mxu0 }
 0x583   : > { %v1827_v4 = vpop.f32.mrb[5].mxu0  ;;  %v1826_v51 = vadd.f32 %v1825_v9, %v1754_v5 }
 0x584   : > { %v1828_v35 = vadd.f32 %v1827_v4, %v1754_v5 }
 0x585   : > { %v2051_v15 = vmul.f32 0.2, %v1826_v51  ;;  %vm2043_vm11 = vcmp.gt.f32.partialorder %v1826_v51, 0.0 }
 0x586   : > { %v2052_v12 = vmul.f32 0.2, %v1828_v35  ;;  %vm2044_vm6 = vcmp.gt.f32.partialorder %v1828_v35, 0.0 }
 0x587   : > { %v5095_v17 = vsel %vm2043_vm11, %v1826_v51, %v2051_v15 }
 0x588   : > { %v5097_v7 = vsel %vm2044_vm6, %v1828_v35, %v2052_v12  ;;  %v2076_v33 = vmul.f32 %v5095_v17, %v5095_v17 }
 0x589   : > { %v2077_v22 = vmul.f32 %v5097_v7, %v5097_v7  ;;  %v2067_v54 = vadd.f32 %v5097_v7, %v5095_v17 }
 0x58b   : > { %v1896_v43 = vpop.f32.mrb[4].mxu1  ;;  %v2084_v39 = vadd.f32 %v2077_v22, %v2076_v33 }
 0x58c   : > { %v1898_v29 = vpop.f32.mrb[5].mxu1  ;;  %v1897_v58 = vadd.f32 %v1896_v43, %v1754_v5 }
 0x58d   : > { %v1899_v52 = vadd.f32 %v1898_v29, %v1754_v5 }
 0x58e   : > { %v2053_v18 = vmul.f32 0.2, %v1897_v58  ;;  %vm2045_vm2 = vcmp.gt.f32.partialorder %v1897_v58, 0.0 }
 0x58f   : > { %v2054_v59 = vmul.f32 0.2, %v1899_v52  ;;  %vm2046_vm3 = vcmp.gt.f32.partialorder %v1899_v52, 0.0 }
 0x590   : > { %v5099_v55 = vsel %vm2045_vm2, %v1897_v58, %v2053_v18 }
 0x591   : > { %v2078_v53 = vmul.f32 %v5099_v55, %v5099_v55  ;;  %v5109_v45 = vsel %vm2046_vm3, %v1899_v52, %v2054_v59  ;;  %v2068_v2 = vadd.f32 %v2067_v54, %v5099_v55 }
 0x592   : > { %v2079_v36 = vmul.f32 %v5109_v45, %v5109_v45 }
 0x593   : > { %v2085_v47 = vadd.f32 %v2084_v39, %v2078_v53  ;;  %v2069_v0 = vadd.f32 %v2068_v2, %v5109_v45 }
 0x595   : > { %v2086_v31 = vadd.f32 %v2085_v47, %v2079_v36 }
 0x59b   : > { %v1967_v32 = vpop.f32.mrb[6].mxu0 }
 0x59c   : > { %v1968_v48 = vadd.f32 %v1967_v32, %v1754_v5  ;;  %v1969_v42 = vpop.f32.mrb[7].mxu0 }
 0x59d   : > { %v1970_v38 = vadd.f32 %v1969_v42, %v1754_v5 }
 0x59e   : > { %vm2047_vm8 = vcmp.gt.f32.partialorder %v1968_v48, 0.0  ;;  %v2055_v6 = vmul.f32 0.2, %v1968_v48  ;;  %v2038_v14 = vpop.f32.mrb[6].mxu1 }
 0x59f   : > { %vm2048_vm7 = vcmp.gt.f32.partialorder %v1970_v38, 0.0  ;;  %v2056_v19 = vmul.f32 0.2, %v1970_v38  ;;  %v2039_v25 = vadd.f32 %v2038_v14, %v1754_v5  ;;  %v2040_v10 = vpop.f32.mrb[7].mxu1 }
 0x5a0   : > { %v2063_v11 = vsel %vm2047_vm8, %v1968_v48, %v2055_v6  ;;  %v2041_v8 = vadd.f32 %v2040_v10, %v1754_v5  ;;  %v2102_v5 = vld [vmem:[%s486_s5] sm:$0xff] }
 0x5a1   : > { %v2070_v16 = vadd.f32 %v2069_v0, %v2063_v11  ;;  %v2080_v56 = vmul.f32 %v2063_v11, %v2063_v11  ;;  %v2064_v20 = vsel %vm2048_vm7, %v1970_v38, %v2056_v19  ;;  %vm2049_vm14 = vcmp.gt.f32.partialorder %v2039_v25, 0.0 }
 0x5a2   : > { %v2081_v46 = vmul.f32 %v2064_v20, %v2064_v20  ;;  %v2057_v28 = vmul.f32 0.2, %v2039_v25  ;;  %vm2050_vm5 = vcmp.gt.f32.partialorder %v2041_v8, 0.0  ;;  %v2058_v63 = vmul.f32 0.2, %v2041_v8 }
 0x5a3   : > { %v2071_v30 = vadd.f32 %v2070_v16, %v2064_v20  ;;  %v2087_v62 = vadd.f32 %v2086_v31, %v2080_v56 }
 0x5a4   : > { %v2065_v21 = vsel %vm2049_vm14, %v2039_v25, %v2057_v28  ;;  %v2066_v13 = vsel %vm2050_vm5, %v2041_v8, %v2058_v63 }
 0x5a5   : > { %v2072_v3 = vadd.f32 %v2071_v30, %v2065_v21  ;;  %v2082_v41 = vmul.f32 %v2065_v21, %v2065_v21  ;;  %v2088_v50 = vadd.f32 %v2087_v62, %v2081_v46  ;;  %v2083_v40 = vmul.f32 %v2066_v13, %v2066_v13 }
 0x5a7   : > { %v2073_v24 = vadd.f32 %v2072_v3, %v2066_v13  ;;  %v2089_v60 = vadd.f32 %v2088_v50, %v2082_v41 }
 0x5a9   : > { %2074 = vadd.xlane.f32.xlu0 %v2073_v24  ;;  %v2090_v26 = vadd.f32 %v2089_v60, %v2083_v40 }
 0x5ab   : > { %2091 = vadd.xlane.f32.xlu1 %v2090_v26 }
 0x636   : > { %v2075_v34 = vpop.xlane.xlu0 %2074 }
 0x637   : > { %v2093_v1 = vmul.f32 0.0009765625, %v2075_v34 }
 0x638   : > { %v2092_v27 = vpop.xlane.xlu1 %2091 }
 0x639   : > { %v2095_v37 = vmul.f32 %v2093_v1, %v2093_v1  ;;  %v2094_v61 = vmul.f32 0.0009765625, %v2092_v27 }
 0x63b   : > { %v2096_v23 = vsub.f32 %v2094_v61, %v2095_v37 }
 0x63d   : > { %v2097_v49 = vmax.f32 %v2096_v23, 0.0 }
 0x63f   : > { %v2098_v57 = vadd.f32 1e-08, %v2097_v49 }
 0x641   : > { %3056 = vrsqrt.f32 %v2098_v57 }
 0x64b   : > { %v3057_v9 = vpop.eup %3056 }
 0x64c   : > { %v2101_v4 = vmul.f32 %v3057_v9, %v2100_v44 }
 0x64e   : > { %2107 = vperm.xlu0 %2928, %v2101_v4   ;;  %v2103_v51 = vmul.f32 %v2101_v4, %v2093_v1 }
 0x650   : > { %v2104_v35 = vsub.f32 %v2102_v5, %v2103_v51 }
 0x652   : > { %2120 = vperm.xlu1 %2927, %v2104_v35  }
 0x6cd   : > { %v2108_v43 = vpop.permute.xlu0 %2107 }
 0x6ce   : > { %v2110_v29 = vmul.f32 %v2108_v43, %v5095_v17  ;;  %v2111_v58 = vmul.f32 %v2108_v43, %v5097_v7  ;;  %v2112_v15 = vmul.f32 %v2108_v43, %v5099_v55  ;;  %v2113_v12 = vmul.f32 %v2108_v43, %v5109_v45 }
 0x6cf   : > { %v2114_v18 = vmul.f32 %v2108_v43, %v2063_v11  ;;  %v2115_v52 = vmul.f32 %v2108_v43, %v2064_v20  ;;  %v2116_v59 = vmul.f32 %v2108_v43, %v2065_v21  ;;  %v2117_v33 = vmul.f32 %v2108_v43, %v2066_v13 }
 0x6d1   : > { %v2121_v22 = vpop.permute.xlu1 %2120 }
 0x6d2   : > { %v2123_v53 = vadd.f32 %v2121_v22, %v2110_v29  ;;  %v2124_v54 = vadd.f32 %v2121_v22, %v2111_v58  ;;  %v2125_v39 = vadd.f32 %v2121_v22, %v2112_v15  ;;  %v2126_v17 = vadd.f32 %v2121_v22, %v2113_v12 }
 0x6d3   : > { %v2127_v2 = vadd.f32 %v2121_v22, %v2114_v18  ;;  %v2128_v7 = vadd.f32 %v2121_v22, %v2115_v52  ;;  %v2129_v55 = vadd.f32 %v2121_v22, %v2116_v59  ;;  %v2130_v32 = vadd.f32 %v2121_v22, %v2117_v33 }
 0x6d4   : > { %2131 = vst [vmem:[%s540_s29] sm:$0xff] %v2123_v53  ;;  %2132 = vst [vmem:[%s540_s29 + $0x8] sm:$0xff] %v2124_v54 }
 0x6d5   : > { %2133 = vst [vmem:[%s540_s29 + $0x10] sm:$0xff] %v2125_v39  ;;  %2134 = vst [vmem:[%s540_s29 + $0x18] sm:$0xff] %v2126_v17 }
 0x6d6   : > { %2135 = vst [vmem:[%s540_s29 + $0x20] sm:$0xff] %v2127_v2  ;;  %2136 = vst [vmem:[%s540_s29 + $0x28] sm:$0xff] %v2128_v7 }
 0x6d7   : > { %2137 = vst [vmem:[%s540_s29 + $0x30] sm:$0xff] %v2129_v55  ;;  %2138 = vst [vmem:[%s540_s29 + $0x38] sm:$0xff] %v2130_v32 }
 0x6d8   : > { %3333 = shalt.err (!%p3330_p13)
}
 0x6d9   : > { %s3334_s11 = scalar_lea.hbm %s5128_s3, 1024  ;;  %s3338_s27 = scalar_lea.hbm %s5587_s17, 2048 }
 0x6da   : > { %p3335_p1 = scmp.ne.s32.totalorder %s5128_s3, %s3334_s11  ;;  %p3339_p2 = scmp.lt.u32.totalorder %s5128_s3, %s5587_s17 }
 0x6db   : > { %p3340_p5 = scmp.lt.u32.totalorder %s3338_s27, %s3334_s11  ;;  %p3342_p4 = scmp.lt.u32.totalorder %s3334_s11, %s5128_s3 }
 0x6dc   : > { %p3336_p6 = pnand %p3335_p1, %p5588_p8 }
 0x6dd   : > { %p3341_p0 = por %p3340_p5, %p3339_p2 }
 0x6de   : > { %p3337_p9 = pneg %p3336_p6 }
 0x6df   : > { %p3343_p10 = por %p3342_p4, %p3341_p0 }
 0x6e1   : > { %p3344_p7 = pnand %p3343_p10, %p3337_p9 }
 0x6e3   : > { %3347 = shalt.err (!%p3344_p7)
}
 0x6e4   : > { %2710 = dma.vmem_to_hbm [thread:$0]  (%p5588_p8), %s5130_s24, 1024, %s5128_s3, %s2140_s30  }
 0x6e5 PF: > { %s5589_s28 = sld [smem:[#allocation24_spill]]  ;;  %s5590_s14 = sld [smem:[#allocation27_spill]] }
 0x6e6   : > { %p5592_p12 = scmp.ge.s32.totalorder %s3402_s12, 2 }
 0x6eb   : > { %s2166_s16 = sand.u32 1, %s5589_s28   ;;  %p5591_p3 = scmp.ne.s32.totalorder %s5590_s14, 0 }
 0x6ec   : > { %s2167_s18 = scalar_lea.sflag [#allocation4], %s2166_s16 }
 0x6ed   : > { %p2742_p11 = pnand %p5592_p12, %p5591_p3 }
 0x6ef   : > { %3385 = dma.done.wait (!%p2742_p11), %s2167_s18, 1024  }
 0x6f0   : > { %3387 = vsyncadd (!%p2742_p11), %s2167_s18, 4294966272  ;;  %s5593_s12 = sld [smem:[#allocation28_spill]]  ;;  %s5594_s5 = sld [smem:[#allocation25_spill]] }
 0x6f1   : > { %s5595_s11 = sld [smem:[#allocation29_spill]]  ;;  %s5596_s30 = smov %s3394_s10 }
 0x6f6   : > { %p30_p13 = scmp.ge.s32.totalorder %s5593_s12, 4   ;;  %s5597_s10 = smov %s5594_s5 }
 0x6f8   :  { %32 = sbr.rel (!%p30_p13) target bundleno = 17 (0x11), region = 165 }
 0x6ff   :  { %2172 = vsyncpa [#allocation3], 1 }
 0x700   :  { %2174 = vsyncpa [#allocation3 + $0x1], 1 }
 0x701   :  { %2175 = vsyncpa [#allocation6], 1 }
 0x702   :  { %2176 = vsyncpa [#allocation9], 1 }
 0x703   :  { %2178 = vsyncpa [#allocation9 + $0x1], 1 }
 0x704   :  { %2179 = vsyncpa [#allocation12], 1 }
 0x705   :  { %2180 = vsyncpa [#allocation15], 1 }
 0x706   :  { %2182 = vsyncpa [#allocation15 + $0x1], 1 }
 0x707   :  { %2183 = vsyncpa [#allocation4], 1 }
 0x708   :  { %2185 = vsyncpa [#allocation4 + $0x1], 1 }

</bundles_post_ra>
